<compile_context>
chip_gen: v7x
topology: tpu7x:2x2x1
jax: 0.10.0
libtpu: 0.0.40
codegen_flags: <defaults>
</compile_context>

<pallas_src>
import math

import jax
import jax.numpy as jnp
from jax.experimental import pallas as pl
from jax.experimental.pallas import tpu as pltpu


# ----------------------------------------------------------------------------
# Layer geometry (mirrors the PyTorch module) and bias-packing layout.
# ----------------------------------------------------------------------------
_OUT_DIMS = (544, 272, 136, 68, 1)                       # out_features per Linear
_BIAS_PADDED = tuple(-(-d // 8) * 8 for d in _OUT_DIMS)  # 8-aligned segment sizes
_BIAS_OFFSETS = tuple(int(sum(_BIAS_PADDED[:i])) for i in range(len(_OUT_DIMS)))
_BIAS_TOTAL = int(sum(_BIAS_PADDED))                     # 1032


def _round_up(v, m):
    return -(-v // m) * m


# ----------------------------------------------------------------------------
# Kernel: one batch tile per grid step.
#   x_ref      : (n_inputs, TB)  bf16   (batch on the lane axis)
#   w{1..4}_ref: (out, in)       bf16   (PyTorch weight layout, resident)
#   w5_ref     : (68, 1)         f32    (last-layer weight as a column)
#   b_ref      : (1032, 1)       f32    (all biases, 8-aligned segments)
#   o_ref      : (1, TB)         f32    (lane-dense output row)
# ----------------------------------------------------------------------------
def mlp_kernel(x_ref, w1_ref, w2_ref, w3_ref, w4_ref, w5_ref, b_ref, o_ref):
    def bias(layer_idx):
        off = _BIAS_OFFSETS[layer_idx]
        size = _OUT_DIMS[layer_idx]
        return b_ref[off:off + size, :]          # (size, 1) f32, static slice

    h = x_ref[...]                               # (n_inputs, TB) bf16
    a = None
    for li, w_ref in enumerate((w1_ref, w2_ref, w3_ref, w4_ref)):
        # (out, in) @ (in, TB) -> (out, TB); MXU with f32 accumulation.
        a = jnp.dot(w_ref[...], h, preferred_element_type=jnp.float32)
        a = jnp.maximum(a + bias(li), 0.0)       # bias column broadcasts over lanes
        h = a.astype(jnp.bfloat16)               # feed the next MXU layer in bf16

    # Final Linear(68, 1): elementwise multiply (VPU) + sublane reduce (XLU)
    # instead of a 1-column MXU matmul; result is already the lane-dense row.
    out = jnp.sum(a * w5_ref[...], axis=0, keepdims=True) + bias(4)   # (1, TB) f32
    o_ref[...] = out.astype(o_ref.dtype)


# ----------------------------------------------------------------------------
# Wrapper: layout plumbing (transpose / pad / un-pad) + pallas_call.
# ----------------------------------------------------------------------------
def mlp_forward(x, kernel_params, *, batch_tile=512):
    """x: (B, n_inputs) f32.  kernel_params: output of pack_params()."""
    w1, w2, w3, w4, w5col, bcat = kernel_params
    B, n_in = x.shape

    assert batch_tile % 128 == 0
    # TB choice: 512 is a safe default across generations; v6e (128 MiB VMEM)
    # can raise to 1024-2048, v7x (64 MiB VMEM) should stay <= 512-1024.
    TB = batch_tile if B >= batch_tile else _round_up(B, 128)
    G = -(-B // TB)
    B_pad = G * TB

    # Batch on the lane axis; pad batch up to a multiple of TB with zeros.
    xt = x.T.astype(jnp.bfloat16)                # (n_in, B)
    if B_pad != B:
        xt = jnp.pad(xt, ((0, 0), (0, B_pad - B)))

    in_specs = [
        pl.BlockSpec((n_in, TB), lambda i: (0, i)),     # X: tiled over batch blocks
        pl.BlockSpec(w1.shape, lambda i: (0, 0)),       # weights/biases: resident
        pl.BlockSpec(w2.shape, lambda i: (0, 0)),
        pl.BlockSpec(w3.shape, lambda i: (0, 0)),
        pl.BlockSpec(w4.shape, lambda i: (0, 0)),
        pl.BlockSpec(w5col.shape, lambda i: (0, 0)),
        pl.BlockSpec(bcat.shape, lambda i: (0, 0)),
    ]
    out_specs = pl.BlockSpec((1, TB), lambda i: (0, i))
    out_shape = jax.ShapeDtypeStruct((1, B_pad), jnp.float32)

    flops = 2 * B_pad * (n_in * 544 + 544 * 272 + 272 * 136 + 136 * 68 + 68 * 1)
    bytes_accessed = (xt.size * 2
                      + sum(int(w.size) for w in (w1, w2, w3, w4)) * 2
                      + int(w5col.size) * 4 + int(bcat.size) * 4
                      + B_pad * 4)
    cost = pl.CostEstimate(flops=int(flops), transcendentals=0,
                           bytes_accessed=int(bytes_accessed))

    out = pl.pallas_call(
        mlp_kernel,
        out_shape=out_shape,
        grid_spec=pltpu.PrefetchScalarGridSpec(
            num_scalar_prefetch=0,
            grid=(G,),
            in_specs=in_specs,
            out_specs=out_specs,
        ),
        compiler_params=pltpu.CompilerParams(
            dimension_semantics=("parallel",),   # shards batch blocks over 2 TCs on v7x
        ),
        cost_estimate=cost,
    )(xt, w1, w2, w3, w4, w5col, bcat)

    return out[0, :B].reshape(B, 1)


# ----------------------------------------------------------------------------
# Parameter init mirroring the PyTorch module (xavier_uniform_, bias=0.01),
# stored in PyTorch (out_features, in_features) layout.
# ----------------------------------------------------------------------------
def init_params(key, n_inputs):
    in_dims = (n_inputs,) + _OUT_DIMS[:-1]
    params = []
    for fan_in, fan_out in zip(in_dims, _OUT_DIMS):
        key, sub = jax.random.split(key)
        bound = math.sqrt(6.0 / (fan_in + fan_out))  # xavier_uniform, gain=1
        w = jax.random.uniform(sub, (fan_out, fan_in), jnp.float32,
                               minval=-bound, maxval=bound)
        b = jnp.full((fan_out,), 0.01, dtype=jnp.float32)
        params.append((w, b))
    return params


def pack_params(params):
    """Convert (out,in) f32 torch-layout params into kernel operands."""
    (w1, _), (w2, _), (w3, _), (w4, _), (w5, _) = params
    kw = tuple(w.astype(jnp.bfloat16) for w in (w1, w2, w3, w4))
    w5col = w5.reshape(-1, 1).astype(jnp.float32)            # (68, 1)
    bcat = jnp.zeros((_BIAS_TOTAL, 1), jnp.float32)          # padded entries = 0.0
    for (_, b), off in zip(params, _BIAS_OFFSETS):
        bcat = bcat.at[off:off + b.shape[0], 0].set(b)
    return kw + (w5col, bcat)


# ----------------------------------------------------------------------------
# References.
# ----------------------------------------------------------------------------
def mlp_reference_matched(x, params):
    """Pure-JAX reference with the same bf16-weight / f32-accumulate numerics."""
    h = x
    for li, (w, b) in enumerate(params):
        if li < 4:
            h = jnp.dot(h.astype(jnp.bfloat16), w.T.astype(jnp.bfloat16),
                        preferred_element_type=jnp.float32) + b[None, :]
            h = jnp.maximum(h, 0.0)
        else:
            h = jnp.sum(h * w[0][None, :], axis=1, keepdims=True) + b[0]
    return h


def mlp_reference_f32(x, params):
    """Full-f32 reference of the eval-mode forward pass."""
    h = x
    for li, (w, b) in enumerate(params):
        h = jnp.dot(h, w.T, precision=jax.lax.Precision.HIGHEST) + b[None, :]
        if li < 4:
            h = jnp.maximum(h, 0.0)
    return h


if __name__ == "__main__":
    key = jax.random.PRNGKey(0)
    n_inputs = 32
    batch = 8

    k_x, k_p = jax.random.split(key)
    x = jax.random.normal(k_x, (batch, n_inputs), dtype=jnp.float32)
    params = init_params(k_p, n_inputs)
    kernel_params = pack_params(params)

    out = mlp_forward(x, kernel_params)
    out = jax.block_until_ready(out)
    assert out.shape == (batch, 1), out.shape

    ref_bf16 = mlp_reference_matched(x, params)
    ref_f32 = mlp_reference_f32(x, params)
    assert jnp.allclose(out, ref_bf16, atol=5e-3, rtol=5e-3), (out, ref_bf16)
    assert jnp.allclose(out, ref_f32, atol=5e-2, rtol=5e-2), (out, ref_f32)

    print("KERNEL_OK")
</pallas_src>

<mosaic_0001>
module attributes {stable_mosaic.version = 11 : i64} {
  func.func @mlp_kernel(%arg0: i32, %arg1: memref<32x128xbf16, #tpu.memory_space<vmem>>, %arg2: memref<544x32xbf16, #tpu.memory_space<vmem>>, %arg3: memref<272x544xbf16, #tpu.memory_space<vmem>>, %arg4: memref<136x272xbf16, #tpu.memory_space<vmem>>, %arg5: memref<68x136xbf16, #tpu.memory_space<vmem>>, %arg6: memref<68x1xf32, #tpu.memory_space<vmem>>, %arg7: memref<1032x1xf32, #tpu.memory_space<vmem>>, %arg8: memref<1x128xf32, #tpu.memory_space<vmem>>) attributes {dimension_semantics = [#tpu.dimension_semantics<parallel>], iteration_bounds = array<i64: 1>, scalar_prefetch = 0 : i64, scratch_operands = 0 : i64, tpu.core_type = #tpu.core_type<tc>, window_params = [{transform_indices = @transform_0, window_bounds = array<i64: 32, 128>}, {pipeline_mode = #tpu.pipeline_mode<synchronous>, transform_indices = @transform_1, window_bounds = array<i64: 544, 32>}, {pipeline_mode = #tpu.pipeline_mode<synchronous>, transform_indices = @transform_2, window_bounds = array<i64: 272, 544>}, {pipeline_mode = #tpu.pipeline_mode<synchronous>, transform_indices = @transform_3, window_bounds = array<i64: 136, 272>}, {pipeline_mode = #tpu.pipeline_mode<synchronous>, transform_indices = @transform_4, window_bounds = array<i64: 68, 136>}, {pipeline_mode = #tpu.pipeline_mode<synchronous>, transform_indices = @transform_5, window_bounds = array<i64: 68, 1>}, {pipeline_mode = #tpu.pipeline_mode<synchronous>, transform_indices = @transform_6, window_bounds = array<i64: 1032, 1>}, {transform_indices = @transform_7, window_bounds = array<i64: 1, 128>}]} {
    %c0 = arith.constant 0 : index
    %c0_0 = arith.constant 0 : index
    %0 = vector.load %arg1[%c0, %c0_0] : memref<32x128xbf16, #tpu.memory_space<vmem>>, vector<32x128xbf16>
    %c0_1 = arith.constant 0 : index
    %c0_2 = arith.constant 0 : index
    %1 = vector.load %arg2[%c0_1, %c0_2] : memref<544x32xbf16, #tpu.memory_space<vmem>>, vector<544x32xbf16>
    %cst = arith.constant dense<0.000000e+00> : vector<544x128xf32>
    %2 = tpu.matmul %1, %0, %cst {dimension_numbers = #tpu.dot_dimension_numbers<[1], [0], [0], [1], [0, 0, 1, 1], [], []>} : vector<544x32xbf16>, vector<32x128xbf16>, vector<544x128xf32> -> vector<544x128xf32>
    %c0_3 = arith.constant 0 : index
    %c0_4 = arith.constant 0 : index
    %3 = vector.load %arg7[%c0_3, %c0_4] : memref<1032x1xf32, #tpu.memory_space<vmem>>, vector<544x1xf32>
    %4 = vector.broadcast %3 : vector<544x1xf32> to vector<544x128xf32>
    %5 = arith.addf %2, %4 : vector<544x128xf32>
    %cst_5 = arith.constant 0.000000e+00 : f32
    %6 = vector.broadcast %cst_5 : f32 to vector<544x128xf32>
    %7 = arith.maximumf %5, %6 : vector<544x128xf32>
    %8 = arith.truncf %7 : vector<544x128xf32> to vector<544x128xbf16>
    %c0_6 = arith.constant 0 : index
    %c0_7 = arith.constant 0 : index
    %9 = vector.load %arg3[%c0_6, %c0_7] : memref<272x544xbf16, #tpu.memory_space<vmem>>, vector<272x544xbf16>
    %cst_8 = arith.constant dense<0.000000e+00> : vector<272x128xf32>
    %10 = tpu.matmul %9, %8, %cst_8 {dimension_numbers = #tpu.dot_dimension_numbers<[1], [0], [0], [1], [0, 0, 1, 1], [], []>} : vector<272x544xbf16>, vector<544x128xbf16>, vector<272x128xf32> -> vector<272x128xf32>
    %c544 = arith.constant 544 : index
    %c0_9 = arith.constant 0 : index
    %11 = vector.load %arg7[%c544, %c0_9] : memref<1032x1xf32, #tpu.memory_space<vmem>>, vector<272x1xf32>
    %12 = vector.broadcast %11 : vector<272x1xf32> to vector<272x128xf32>
    %13 = arith.addf %10, %12 : vector<272x128xf32>
    %cst_10 = arith.constant 0.000000e+00 : f32
    %14 = vector.broadcast %cst_10 : f32 to vector<272x128xf32>
    %15 = arith.maximumf %13, %14 : vector<272x128xf32>
    %16 = arith.truncf %15 : vector<272x128xf32> to vector<272x128xbf16>
    %c0_11 = arith.constant 0 : index
    %c0_12 = arith.constant 0 : index
    %17 = vector.load %arg4[%c0_11, %c0_12] : memref<136x272xbf16, #tpu.memory_space<vmem>>, vector<136x272xbf16>
    %cst_13 = arith.constant dense<0.000000e+00> : vector<136x128xf32>
    %18 = tpu.matmul %17, %16, %cst_13 {dimension_numbers = #tpu.dot_dimension_numbers<[1], [0], [0], [1], [0, 0, 1, 1], [], []>} : vector<136x272xbf16>, vector<272x128xbf16>, vector<136x128xf32> -> vector<136x128xf32>
    %c816 = arith.constant 816 : index
    %c0_14 = arith.constant 0 : index
    %19 = vector.load %arg7[%c816, %c0_14] : memref<1032x1xf32, #tpu.memory_space<vmem>>, vector<136x1xf32>
    %20 = vector.broadcast %19 : vector<136x1xf32> to vector<136x128xf32>
    %21 = arith.addf %18, %20 : vector<136x128xf32>
    %cst_15 = arith.constant 0.000000e+00 : f32
    %22 = vector.broadcast %cst_15 : f32 to vector<136x128xf32>
    %23 = arith.maximumf %21, %22 : vector<136x128xf32>
    %24 = arith.truncf %23 : vector<136x128xf32> to vector<136x128xbf16>
    %c0_16 = arith.constant 0 : index
    %c0_17 = arith.constant 0 : index
    %25 = vector.load %arg5[%c0_16, %c0_17] : memref<68x136xbf16, #tpu.memory_space<vmem>>, vector<68x136xbf16>
    %cst_18 = arith.constant dense<0.000000e+00> : vector<68x128xf32>
    %26 = tpu.matmul %25, %24, %cst_18 {dimension_numbers = #tpu.dot_dimension_numbers<[1], [0], [0], [1], [0, 0, 1, 1], [], []>} : vector<68x136xbf16>, vector<136x128xbf16>, vector<68x128xf32> -> vector<68x128xf32>
    %c952 = arith.constant 952 : index
    %c0_19 = arith.constant 0 : index
    %27 = vector.load %arg7[%c952, %c0_19] : memref<1032x1xf32, #tpu.memory_space<vmem>>, vector<68x1xf32>
    %28 = vector.broadcast %27 : vector<68x1xf32> to vector<68x128xf32>
    %29 = arith.addf %26, %28 : vector<68x128xf32>
    %cst_20 = arith.constant 0.000000e+00 : f32
    %30 = vector.broadcast %cst_20 : f32 to vector<68x128xf32>
    %31 = arith.maximumf %29, %30 : vector<68x128xf32>
    %c0_21 = arith.constant 0 : index
    %c0_22 = arith.constant 0 : index
    %32 = vector.load %arg6[%c0_21, %c0_22] : memref<68x1xf32, #tpu.memory_space<vmem>>, vector<68x1xf32>
    %33 = vector.broadcast %32 : vector<68x1xf32> to vector<68x128xf32>
    %34 = arith.mulf %31, %33 : vector<68x128xf32>
    %cst_23 = arith.constant dense<0.000000e+00> : vector<128xf32>
    %35 = vector.multi_reduction <add>, %34, %cst_23 [0] : vector<68x128xf32> to vector<128xf32>
    %36 = vector.shape_cast %35 : vector<128xf32> to vector<1x128xf32>
    %c1024 = arith.constant 1024 : index
    %c0_24 = arith.constant 0 : index
    %37 = vector.load %arg7[%c1024, %c0_24] : memref<1032x1xf32, #tpu.memory_space<vmem>>, vector<1x1xf32>
    %38 = vector.broadcast %37 : vector<1x1xf32> to vector<1x128xf32>
    %39 = arith.addf %36, %38 : vector<1x128xf32>
    %c0_25 = arith.constant 0 : index
    %c0_26 = arith.constant 0 : index
    %40 = vector.load %arg8[%c0_25, %c0_26] : memref<1x128xf32, #tpu.memory_space<vmem>>, vector<1x128xf32>
    tpu.vector_store %arg8[%c0_25, %c0_26], %39 {strides = array<i32>} : memref<1x128xf32, #tpu.memory_space<vmem>>, vector<1x128xf32>,
    return
  }
  func.func @transform_0(%arg0: i32) -> (i32, i32) {
    %c0_i32 = arith.constant 0 : i32
    %c0_i32_0 = arith.constant 0 : i32
    return %c0_i32, %arg0 : i32, i32
  }
  func.func @transform_1(%arg0: i32) -> (i32, i32) {
    %c0_i32 = arith.constant 0 : i32
    %c0_i32_0 = arith.constant 0 : i32
    %c0_i32_1 = arith.constant 0 : i32
    return %c0_i32, %c0_i32_0 : i32, i32
  }
  func.func @transform_2(%arg0: i32) -> (i32, i32) {
    %c0_i32 = arith.constant 0 : i32
    %c0_i32_0 = arith.constant 0 : i32
    %c0_i32_1 = arith.constant 0 : i32
    return %c0_i32, %c0_i32_0 : i32, i32
  }
  func.func @transform_3(%arg0: i32) -> (i32, i32) {
    %c0_i32 = arith.constant 0 : i32
    %c0_i32_0 = arith.constant 0 : i32
    %c0_i32_1 = arith.constant 0 : i32
    return %c0_i32, %c0_i32_0 : i32, i32
  }
  func.func @transform_4(%arg0: i32) -> (i32, i32) {
    %c0_i32 = arith.constant 0 : i32
    %c0_i32_0 = arith.constant 0 : i32
    %c0_i32_1 = arith.constant 0 : i32
    return %c0_i32, %c0_i32_0 : i32, i32
  }
  func.func @transform_5(%arg0: i32) -> (i32, i32) {
    %c0_i32 = arith.constant 0 : i32
    %c0_i32_0 = arith.constant 0 : i32
    %c0_i32_1 = arith.constant 0 : i32
    return %c0_i32, %c0_i32_0 : i32, i32
  }
  func.func @transform_6(%arg0: i32) -> (i32, i32) {
    %c0_i32 = arith.constant 0 : i32
    %c0_i32_0 = arith.constant 0 : i32
    %c0_i32_1 = arith.constant 0 : i32
    return %c0_i32, %c0_i32_0 : i32, i32
  }
  func.func @transform_7(%arg0: i32) -> (i32, i32) {
    %c0_i32 = arith.constant 0 : i32
    %c0_i32_0 = arith.constant 0 : i32
    return %c0_i32, %arg0 : i32, i32
  }
}

</mosaic_0001>

<bundles_post_ra>
// kernel: tpu_custom_call.1
= control target key start
LH: loop header
LB: loop body
LE: loop exit
PB: predicated region body
PF: predicated region fallthrough
CT: control target
= control target key end

     0   :  { %v4332_v2 = vmov 0   ;;  %vm690_vm0 = vcmask 261120   ;;  %s5772_s0 = inlined_call_operand.vmem [shape: bf16[32,128], index: 0, kind: input, shape index: {}]   ;;  %s5773_s1 = inlined_call_operand.vmem [shape: bf16[544,32], index: 1, kind: input, shape index: {}]   ;;  %s5774_s2 = inlined_call_operand.vmem [shape: bf16[272,544], index: 2, kind: input, shape index: {}]   ;;  %s5775_s3 = inlined_call_operand.vmem [shape: bf16[136,272], index: 3, kind: input, shape index: {}]   ;;  %s5776_s4 = inlined_call_operand.vmem [shape: bf16[68,136], index: 4, kind: input, shape index: {}]   ;;  %s5777_s5 = inlined_call_operand.vmem [shape: f32[68,1], index: 5, kind: input, shape index: {}]   ;;  %s5778_s6 = inlined_call_operand.vmem [shape: f32[1032,1], index: 6, kind: input, shape index: {}]   ;;  %s5779_s7 = inlined_call_operand.hbm [shape: f32[1,128], index: 7, kind: output, shape index: {}]  }
   0x1   :  { %v102_v0 = vld [vmem:[%s5778_s6 + $0x10] sm:$0xff]  ;;  %v100_v1 = vld [vmem:[%s5778_s6] sm:$0xff]  ;;  %4103 = vset.pattern.permute.xlu1 %v4332_v2  ;;  %4102 = vset.pattern.permute.xlu0 %v4332_v2  ;;  %v103_v4 = vld [vmem:[%s5778_s6 + $0x18] sm:$0xff] }
   0x2   :  { %v4104_v3 = vld [vmem:[%s5772_s0] sm:$0xff]   ;;  %180 = vperm.xlu1 %4103, %v102_v0   ;;  %170 = vperm.xlu0 %4102, %v100_v1   ;;  %v101_v5 = vld [vmem:[%s5778_s6 + $0x8] sm:$0xff]  ;;  %v4108_v11 = vld [vmem:[%s5773_s1 + $0x10] sm:$0xff]  }
   0x3   :  { %3732 = vmatprep.subr.bf16.mxu0 %v4104_v3  ;;  %v4105_v6 = vld [vmem:[%s5772_s0 + $0x8] sm:$0xff]   ;;  %3914 = vmatprep.subr.bf16.mxu1 %v4332_v2  ;;  %v4106_v7 = vld [vmem:[%s5773_s1] sm:$0xff]   ;;  %v107_v12 = vld [vmem:[%s5778_s6 + $0x38] sm:$0xff] }
   0x4   :  { %3733 = vmatpush3.bf16.msra.mxu0 %v4104_v3  ;;  %v105_v8 = vld [vmem:[%s5778_s6 + $0x28] sm:$0xff]  ;;  %v104_v9 = vld [vmem:[%s5778_s6 + $0x20] sm:$0xff]  ;;  %3736 = vmatprep.mubr.msk.bf16.mxu0 %vm690_vm0, %v4106_v7  ;;  %v106_v13 = vld [vmem:[%s5778_s6 + $0x30] sm:$0xff] }
   0x5   :  { %3734 = vmatprep.subr.bf16.mxu0 %v4105_v6  ;;  %v4107_v10 = vld [vmem:[%s5773_s1 + $0x8] sm:$0xff]   ;;  %v108_v15 = vld [vmem:[%s5778_s6 + $0x40] sm:$0xff]  ;;  %v4109_v16 = vld [vmem:[%s5773_s1 + $0x18] sm:$0xff]  }
   0x6   :  { %185 = vperm.xlu1 %4103, %v103_v4   ;;  %175 = vperm.xlu0 %4102, %v101_v5   ;;  %v109_v14 = vld [vmem:[%s5778_s6 + $0x48] sm:$0xff]  ;;  %v4110_v17 = vld [vmem:[%s5773_s1 + $0x20] sm:$0xff]   ;;  %v111_v18 = vld [vmem:[%s5778_s6 + $0x58] sm:$0xff] }
   0x7   :  { %v110_v19 = vld [vmem:[%s5778_s6 + $0x50] sm:$0xff]  ;;  %v113_v20 = vld [vmem:[%s5778_s6 + $0x68] sm:$0xff]  ;;  %v112_v21 = vld [vmem:[%s5778_s6 + $0x60] sm:$0xff] }
   0x8   :  { %3735 = vmatpush3.bf16.msra.mxu0 %v4105_v6  ;;  %v4111_v22 = vld [vmem:[%s5773_s1 + $0x28] sm:$0xff]   ;;  %v4112_v23 = vld [vmem:[%s5773_s1 + $0x30] sm:$0xff]   ;;  %v115_v24 = vld [vmem:[%s5778_s6 + $0x78] sm:$0xff] }
   0x9   :  { %1982 = vmatprep.subr.bf16.mxu0 %v4332_v2  ;;  %v114_v25 = vld [vmem:[%s5778_s6 + $0x70] sm:$0xff]  ;;  %v117_v26 = vld [vmem:[%s5778_s6 + $0x88] sm:$0xff]  ;;  %v116_v27 = vld [vmem:[%s5778_s6 + $0x80] sm:$0xff] }
   0xa   :  { %195 = vperm.xlu1 %4103, %v105_v8   ;;  %190 = vperm.xlu0 %4102, %v104_v9   ;;  %v4113_v28 = vld [vmem:[%s5773_s1 + $0x38] sm:$0xff]   ;;  %v4114_v29 = vld [vmem:[%s5773_s1 + $0x40] sm:$0xff]   ;;  %v118_v31 = vld [vmem:[%s5778_s6 + $0x90] sm:$0xff] }
   0xb   :  { %3737 = vmatmul.mubr.msk.bf16.vlgmr.msra.gmra.mrb[0].mxu0 %vm690_vm0, %v4107_v10  ;;  %v119_v30 = vld [vmem:[%s5778_s6 + $0x98] sm:$0xff]  ;;  %v121_v32 = vld [vmem:[%s5778_s6 + $0xa8] sm:$0xff]  ;;  %v120_v33 = vld [vmem:[%s5778_s6 + $0xa0] sm:$0xff] }
   0xc   :  { %3740 = vmatprep.mubr.msk.bf16.mxu0 %vm690_vm0, %v4108_v11  ;;  %v4115_v34 = vld [vmem:[%s5773_s1 + $0x48] sm:$0xff]   ;;  %v4116_v35 = vld [vmem:[%s5773_s1 + $0x50] sm:$0xff]   ;;  %v123_v36 = vld [vmem:[%s5778_s6 + $0xb8] sm:$0xff] }
   0xd   :  { %v122_v37 = vld [vmem:[%s5778_s6 + $0xb0] sm:$0xff]  ;;  %v125_v38 = vld [vmem:[%s5778_s6 + $0xc8] sm:$0xff]  ;;  %v124_v39 = vld [vmem:[%s5778_s6 + $0xc0] sm:$0xff] }
   0xe   :  { %205 = vperm.xlu1 %4103, %v107_v12   ;;  %200 = vperm.xlu0 %4102, %v106_v13   ;;  %v4117_v40 = vld [vmem:[%s5773_s1 + $0x58] sm:$0xff]   ;;  %v4118_v41 = vld [vmem:[%s5773_s1 + $0x60] sm:$0xff]   ;;  %v126_v43 = vld [vmem:[%s5778_s6 + $0xd0] sm:$0xff] }
   0xf   :  { %v127_v42 = vld [vmem:[%s5778_s6 + $0xd8] sm:$0xff]  ;;  %v129_v44 = vld [vmem:[%s5778_s6 + $0xe8] sm:$0xff]  ;;  %v128_v45 = vld [vmem:[%s5778_s6 + $0xe0] sm:$0xff] }
  0x10   :  { %v4119_v46 = vld [vmem:[%s5773_s1 + $0x68] sm:$0xff]   ;;  %v4120_v47 = vld [vmem:[%s5773_s1 + $0x70] sm:$0xff]   ;;  %v131_v48 = vld [vmem:[%s5778_s6 + $0xf8] sm:$0xff] }
  0x11   :  { %v130_v49 = vld [vmem:[%s5778_s6 + $0xf0] sm:$0xff]  ;;  %v133_v50 = vld [vmem:[%s5778_s6 + $0x108] sm:$0xff]  ;;  %v132_v51 = vld [vmem:[%s5778_s6 + $0x100] sm:$0xff] }
  0x12   :  { %215 = vperm.xlu1 %4103, %v109_v14   ;;  %210 = vperm.xlu0 %4102, %v108_v15   ;;  %v4121_v52 = vld [vmem:[%s5773_s1 + $0x78] sm:$0xff]   ;;  %v4122_v53 = vld [vmem:[%s5773_s1 + $0x80] sm:$0xff]   ;;  %v134_v55 = vld [vmem:[%s5778_s6 + $0x110] sm:$0xff] }
  0x13   :  { %3741 = vmatmul.mubr.msk.bf16.gmra.mrb[4].mxu0 %vm690_vm0, %v4109_v16  ;;  %v135_v54 = vld [vmem:[%s5778_s6 + $0x118] sm:$0xff]  ;;  %v137_v56 = vld [vmem:[%s5778_s6 + $0x128] sm:$0xff]  ;;  %v136_v57 = vld [vmem:[%s5778_s6 + $0x120] sm:$0xff] }
  0x14   :  { %3744 = vmatprep.mubr.msk.bf16.mxu0 %vm690_vm0, %v4110_v17  ;;  %v4123_v58 = vld [vmem:[%s5773_s1 + $0x88] sm:$0xff]   ;;  %v4124_v59 = vld [vmem:[%s5773_s1 + $0x90] sm:$0xff]   ;;  %v139_v60 = vld [vmem:[%s5778_s6 + $0x138] sm:$0xff] }
  0x15   :  { %v138_v61 = vld [vmem:[%s5778_s6 + $0x130] sm:$0xff]  ;;  %v141_v62 = vld [vmem:[%s5778_s6 + $0x148] sm:$0xff]  ;;  %v140_v63 = vld [vmem:[%s5778_s6 + $0x140] sm:$0xff] }
  0x16   :  { %225 = vperm.xlu1 %4103, %v111_v18   ;;  %220 = vperm.xlu0 %4102, %v110_v19   ;;  %v4125_v0 = vld [vmem:[%s5773_s1 + $0x98] sm:$0xff]   ;;  %v4126_v1 = vld [vmem:[%s5773_s1 + $0xa0] sm:$0xff]   ;;  %v142_v4 = vld [vmem:[%s5778_s6 + $0x150] sm:$0xff] }
  0x17   :  { %v143_v3 = vld [vmem:[%s5778_s6 + $0x158] sm:$0xff]  ;;  %v145_v5 = vld [vmem:[%s5778_s6 + $0x168] sm:$0xff]  ;;  %v144_v6 = vld [vmem:[%s5778_s6 + $0x160] sm:$0xff] }
  0x18   :  { %v4127_v7 = vld [vmem:[%s5773_s1 + $0xa8] sm:$0xff]   ;;  %v4128_v8 = vld [vmem:[%s5773_s1 + $0xb0] sm:$0xff]   ;;  %v147_v9 = vld [vmem:[%s5778_s6 + $0x178] sm:$0xff] }
  0x19   :  { %v146_v10 = vld [vmem:[%s5778_s6 + $0x170] sm:$0xff]  ;;  %v149_v11 = vld [vmem:[%s5778_s6 + $0x188] sm:$0xff]  ;;  %v148_v12 = vld [vmem:[%s5778_s6 + $0x180] sm:$0xff] }
  0x1a   :  { %235 = vperm.xlu1 %4103, %v113_v20   ;;  %230 = vperm.xlu0 %4102, %v112_v21   ;;  %v4129_v13 = vld [vmem:[%s5773_s1 + $0xb8] sm:$0xff]   ;;  %v4130_v14 = vld [vmem:[%s5773_s1 + $0xc0] sm:$0xff]   ;;  %v150_v16 = vld [vmem:[%s5778_s6 + $0x190] sm:$0xff] }
  0x1b   :  { %3745 = vmatmul.mubr.msk.bf16.gmra.mrb[8].mxu0 %vm690_vm0, %v4111_v22  ;;  %v151_v15 = vld [vmem:[%s5778_s6 + $0x198] sm:$0xff]  ;;  %v153_v17 = vld [vmem:[%s5778_s6 + $0x1a8] sm:$0xff]  ;;  %v152_v18 = vld [vmem:[%s5778_s6 + $0x1a0] sm:$0xff] }
  0x1c   :  { %3748 = vmatprep.mubr.msk.bf16.mxu0 %vm690_vm0, %v4112_v23  ;;  %v4131_v19 = vld [vmem:[%s5773_s1 + $0xc8] sm:$0xff]   ;;  %v4132_v20 = vld [vmem:[%s5773_s1 + $0xd0] sm:$0xff]   ;;  %v155_v21 = vld [vmem:[%s5778_s6 + $0x1b8] sm:$0xff] }
  0x1d   :  { %v154_v22 = vld [vmem:[%s5778_s6 + $0x1b0] sm:$0xff]  ;;  %v157_v23 = vld [vmem:[%s5778_s6 + $0x1c8] sm:$0xff] }
  0x1e   :  { %245 = vperm.xlu1 %4103, %v115_v24   ;;  %240 = vperm.xlu0 %4102, %v114_v25   ;;  %v156_v24 = vld [vmem:[%s5778_s6 + $0x1c0] sm:$0xff]  ;;  %v4133_v25 = vld [vmem:[%s5773_s1 + $0xd8] sm:$0xff]  }
  0x22   :  { %255 = vperm.xlu1 %4103, %v117_v26   ;;  %250 = vperm.xlu0 %4102, %v116_v27   ;;  %v4134_v26 = vld [vmem:[%s5773_s1 + $0xe0] sm:$0xff]   ;;  %v159_v27 = vld [vmem:[%s5778_s6 + $0x1d8] sm:$0xff] }
  0x23   :  { %3749 = vmatmul.mubr.msk.bf16.gmra.mrb[12].mxu0 %vm690_vm0, %v4113_v28  ;;  %v158_v28 = vld [vmem:[%s5778_s6 + $0x1d0] sm:$0xff] }
  0x24   :  { %3752 = vmatprep.mubr.msk.bf16.mxu0 %vm690_vm0, %v4114_v29  ;;  %v161_v29 = vld [vmem:[%s5778_s6 + $0x1e8] sm:$0xff] }
  0x26   :  { %265 = vperm.xlu1 %4103, %v119_v30   ;;  %260 = vperm.xlu0 %4102, %v118_v31   ;;  %v160_v30 = vld [vmem:[%s5778_s6 + $0x1e0] sm:$0xff]  ;;  %v4135_v31 = vld [vmem:[%s5773_s1 + $0xe8] sm:$0xff]  }
  0x2a   :  { %275 = vperm.xlu1 %4103, %v121_v32   ;;  %270 = vperm.xlu0 %4102, %v120_v33   ;;  %v4136_v32 = vld [vmem:[%s5773_s1 + $0xf0] sm:$0xff]   ;;  %v163_v33 = vld [vmem:[%s5778_s6 + $0x1f8] sm:$0xff] }
  0x2b   :  { %3753 = vmatmul.mubr.msk.bf16.gmra.mrb[16].mxu0 %vm690_vm0, %v4115_v34  ;;  %v162_v34 = vld [vmem:[%s5778_s6 + $0x1f0] sm:$0xff] }
  0x2c   :  { %3756 = vmatprep.mubr.msk.bf16.mxu0 %vm690_vm0, %v4116_v35 }
  0x2e   :  { %285 = vperm.xlu1 %4103, %v123_v36   ;;  %280 = vperm.xlu0 %4102, %v122_v37  }
  0x32   :  { %295 = vperm.xlu1 %4103, %v125_v38   ;;  %290 = vperm.xlu0 %4102, %v124_v39  }
  0x33   :  { %3757 = vmatmul.mubr.msk.bf16.gmra.mrb[20].mxu0 %vm690_vm0, %v4117_v40 }
  0x34   :  { %3760 = vmatprep.mubr.msk.bf16.mxu0 %vm690_vm0, %v4118_v41 }
  0x36   :  { %305 = vperm.xlu1 %4103, %v127_v42   ;;  %300 = vperm.xlu0 %4102, %v126_v43  }
  0x3a   :  { %315 = vperm.xlu1 %4103, %v129_v44   ;;  %310 = vperm.xlu0 %4102, %v128_v45  }
  0x3b   :  { %3761 = vmatmul.mubr.msk.bf16.gmra.mrb[24].mxu0 %vm690_vm0, %v4119_v46 }
  0x3c   :  { %3764 = vmatprep.mubr.msk.bf16.mxu0 %vm690_vm0, %v4120_v47 }
  0x3e   :  { %325 = vperm.xlu1 %4103, %v131_v48   ;;  %320 = vperm.xlu0 %4102, %v130_v49  }
  0x42   :  { %335 = vperm.xlu1 %4103, %v133_v50   ;;  %330 = vperm.xlu0 %4102, %v132_v51  }
  0x43   :  { %3765 = vmatmul.mubr.msk.bf16.gmra.mrb[28].mxu0 %vm690_vm0, %v4121_v52 }
  0x44   :  { %3768 = vmatprep.mubr.msk.bf16.mxu0 %vm690_vm0, %v4122_v53 }
  0x46   :  { %345 = vperm.xlu1 %4103, %v135_v54   ;;  %340 = vperm.xlu0 %4102, %v134_v55  }
  0x4a   :  { %355 = vperm.xlu1 %4103, %v137_v56   ;;  %350 = vperm.xlu0 %4102, %v136_v57  }
  0x4b   :  { %3769 = vmatmul.mubr.msk.bf16.gmra.mrb[32].mxu0 %vm690_vm0, %v4123_v58 }
  0x4c   :  { %3772 = vmatprep.mubr.msk.bf16.mxu0 %vm690_vm0, %v4124_v59 }
  0x4e   :  { %365 = vperm.xlu1 %4103, %v139_v60   ;;  %360 = vperm.xlu0 %4102, %v138_v61  }
  0x52   :  { %375 = vperm.xlu1 %4103, %v141_v62   ;;  %370 = vperm.xlu0 %4102, %v140_v63  }
  0x53   :  { %3773 = vmatmul.mubr.msk.bf16.gmra.mrb[36].mxu0 %vm690_vm0, %v4125_v0 }
  0x54   :  { %3776 = vmatprep.mubr.msk.bf16.mxu0 %vm690_vm0, %v4126_v1 }
  0x56   :  { %385 = vperm.xlu1 %4103, %v143_v3   ;;  %380 = vperm.xlu0 %4102, %v142_v4  }
  0x5a   :  { %395 = vperm.xlu1 %4103, %v145_v5   ;;  %390 = vperm.xlu0 %4102, %v144_v6  }
  0x5b   :  { %3777 = vmatmul.mubr.msk.bf16.gmra.mrb[40].mxu0 %vm690_vm0, %v4127_v7 }
  0x5c   :  { %3780 = vmatprep.mubr.msk.bf16.mxu0 %vm690_vm0, %v4128_v8 }
  0x5e   :  { %405 = vperm.xlu1 %4103, %v147_v9   ;;  %400 = vperm.xlu0 %4102, %v146_v10  }
  0x62   :  { %415 = vperm.xlu1 %4103, %v149_v11   ;;  %410 = vperm.xlu0 %4102, %v148_v12  }
  0x63   :  { %3781 = vmatmul.mubr.msk.bf16.gmra.mrb[44].mxu0 %vm690_vm0, %v4129_v13 }
  0x64   :  { %3784 = vmatprep.mubr.msk.bf16.mxu0 %vm690_vm0, %v4130_v14 }
  0x66   :  { %425 = vperm.xlu1 %4103, %v151_v15   ;;  %420 = vperm.xlu0 %4102, %v150_v16  }
  0x6a   :  { %435 = vperm.xlu1 %4103, %v153_v17   ;;  %430 = vperm.xlu0 %4102, %v152_v18  }
  0x6b   :  { %3785 = vmatmul.mubr.msk.bf16.gmra.mrb[48].mxu0 %vm690_vm0, %v4131_v19 }
  0x6c   :  { %3788 = vmatprep.mubr.msk.bf16.mxu0 %vm690_vm0, %v4132_v20 }
  0x6e   :  { %445 = vperm.xlu1 %4103, %v155_v21   ;;  %440 = vperm.xlu0 %4102, %v154_v22  }
  0x72   :  { %455 = vperm.xlu1 %4103, %v157_v23   ;;  %450 = vperm.xlu0 %4102, %v156_v24  }
  0x73   :  { %3789 = vmatmul.mubr.msk.bf16.gmra.mrb[52].mxu0 %vm690_vm0, %v4133_v25 }
  0x74   :  { %3792 = vmatprep.mubr.msk.bf16.mxu0 %vm690_vm0, %v4134_v26 }
  0x76   :  { %465 = vperm.xlu1 %4103, %v159_v27   ;;  %460 = vperm.xlu0 %4102, %v158_v28  }
  0x7a   :  { %475 = vperm.xlu1 %4103, %v161_v29   ;;  %470 = vperm.xlu0 %4102, %v160_v30  }
  0x7b   :  { %3793 = vmatmul.mubr.msk.bf16.gmra.mrb[56].mxu0 %vm690_vm0, %v4135_v31 }
  0x7c   :  { %3796 = vmatprep.mubr.msk.bf16.mxu0 %vm690_vm0, %v4136_v32 }
  0x7d   :  { %12 = vsyncpa [#allocation3], 0  ;;  %v165_v35 = vld [vmem:[%s5778_s6 + $0x208] sm:$0xff]  ;;  %v164_v36 = vld [vmem:[%s5778_s6 + $0x200] sm:$0xff]  ;;  %vm4334_vm1 = vmmov 0   ;;  %vm2806_vm2 = vcmask 130048  }
  0x7e   :  { %485 = vperm.xlu1 %4103, %v163_v33   ;;  %480 = vperm.xlu0 %4102, %v162_v34   ;;  %v4137_v37 = vld [vmem:[%s5773_s1 + $0xf8] sm:$0xff]   ;;  %v4138_v38 = vld [vmem:[%s5773_s1 + $0x100] sm:$0xff]   ;;  %v166_v40 = vld [vmem:[%s5778_s6 + $0x210] sm:$0xff]  ;;  %vm3173_vm3 = vcmask 64512   ;;  %vm3189_vm4 = vcmask 1043456  }
  0x7f   :  { %v167_v39 = vld [vmem:[%s5778_s6 + $0x218] sm:$0xff]  ;;  %v1319_v41 = vld [vmem:[%s5778_s6 + $0x2a8] sm:$0xff]  ;;  %v1318_v42 = vld [vmem:[%s5778_s6 + $0x2a0] sm:$0xff] }
  0x80   :  { %v4139_v43 = vld [vmem:[%s5773_s1 + $0x108] sm:$0xff]   ;;  %v1302_v45 = vld [vmem:[%s5778_s6 + $0x220] sm:$0xff]  ;;  %v1305_v46 = vld [vmem:[%s5778_s6 + $0x238] sm:$0xff] }
  0x81   :  { %v1303_v44 = vld [vmem:[%s5778_s6 + $0x228] sm:$0xff]  ;;  %v1304_v47 = vld [vmem:[%s5778_s6 + $0x230] sm:$0xff]  ;;  %v1321_v48 = vld [vmem:[%s5778_s6 + $0x2b8] sm:$0xff]  ;;  %v4756_v52 = vpop.permute.xlu0 %170  ;;  %v4758_v53 = vpop.permute.xlu1 %180 }
  0x82   :  { %495 = vperm.xlu1 %4103, %v165_v35   ;;  %490 = vperm.xlu0 %4102, %v164_v36   ;;  %v1320_v49 = vld [vmem:[%s5778_s6 + $0x2b0] sm:$0xff]  ;;  %v1307_v50 = vld [vmem:[%s5778_s6 + $0x248] sm:$0xff]  ;;  %v1306_v51 = vld [vmem:[%s5778_s6 + $0x240] sm:$0xff] }
  0x83   :  { %3797 = vmatmul.mubr.msk.bf16.gmra.mrb[60].mxu0 %vm690_vm0, %v4137_v37  ;;  %v1323_v54 = vld [vmem:[%s5778_s6 + $0x2c8] sm:$0xff]  ;;  %v1322_v55 = vld [vmem:[%s5778_s6 + $0x2c0] sm:$0xff]  ;;  %v1309_v57 = vld [vmem:[%s5778_s6 + $0x258] sm:$0xff] }
  0x84   :  { %3800 = vmatprep.mubr.msk.bf16.mxu0 %vm690_vm0, %v4138_v38  ;;  %v1308_v58 = vld [vmem:[%s5778_s6 + $0x250] sm:$0xff]  ;;  %v1325_v60 = vld [vmem:[%s5778_s6 + $0x2d8] sm:$0xff]  ;;  %v4145_v0 = vld [vmem:[%s5774_s2 + $0x16c] ss:$20 sps:$4 sm:$0xff]  }
  0x85   :  { %v4766_v56 = vpop.permute.xlu0 %175  ;;  %v4774_v59 = vpop.permute.xlu1 %185  ;;  %v1324_v61 = vld [vmem:[%s5778_s6 + $0x2d0] sm:$0xff]  ;;  %v4142_v63 = vld [vmem:[%s5774_s2 + $0x4] ss:$20 sps:$4 sm:$0xff]   ;;  %v1311_v3 = vld [vmem:[%s5778_s6 + $0x268] sm:$0xff]  ;;  %2086 = vmatprep.mubr.bf16.mxu1 %v4145_v0 }
  0x86   :  { %505 = vperm.xlu1 %4103, %v167_v39   ;;  %500 = vperm.xlu0 %4102, %v166_v40   ;;  %v1310_v4 = vld [vmem:[%s5778_s6 + $0x260] sm:$0xff]  ;;  %v1327_v6 = vld [vmem:[%s5778_s6 + $0x2e8] sm:$0xff]  ;;  %v1313_v9 = vld [vmem:[%s5778_s6 + $0x278] sm:$0xff] }
  0x87   :  { %v1326_v7 = vld [vmem:[%s5778_s6 + $0x2e0] sm:$0xff]  ;;  %v1312_v10 = vld [vmem:[%s5778_s6 + $0x270] sm:$0xff]  ;;  %v1329_v13 = vld [vmem:[%s5778_s6 + $0x2f8] sm:$0xff] }
  0x88   :  { %v1328_v14 = vld [vmem:[%s5778_s6 + $0x2f0] sm:$0xff]  ;;  %v1315_v16 = vld [vmem:[%s5778_s6 + $0x288] sm:$0xff]  ;;  %v1314_v17 = vld [vmem:[%s5778_s6 + $0x280] sm:$0xff] }
  0x89   :  { %v4782_v62 = vpop.permute.xlu0 %190  ;;  %v4790_v1 = vpop.permute.xlu1 %195  ;;  %v1331_v19 = vld [vmem:[%s5778_s6 + $0x308] sm:$0xff]  ;;  %v1330_v20 = vld [vmem:[%s5778_s6 + $0x300] sm:$0xff]  ;;  %v1317_v23 = vld [vmem:[%s5778_s6 + $0x298] sm:$0xff] }
  0x8a   :  { %1423 = vperm.xlu1 %4103, %v1319_v41   ;;  %1418 = vperm.xlu0 %4102, %v1318_v42   ;;  %v1316_v24 = vld [vmem:[%s5778_s6 + $0x290] sm:$0xff]  ;;  %v1333_v26 = vld [vmem:[%s5778_s6 + $0x318] sm:$0xff]  ;;  %v1335_v29 = vld [vmem:[%s5778_s6 + $0x328] sm:$0xff] }
  0x8b   :  { %3801 = vmatmul.mubr.msk.bf16.gmra.mrb[64].mxu0 %vm690_vm0, %v4139_v43  ;;  %v1332_v27 = vld [vmem:[%s5778_s6 + $0x310] sm:$0xff]  ;;  %v1334_v30 = vld [vmem:[%s5778_s6 + $0x320] sm:$0xff]  ;;  %v2575_v33 = vld [vmem:[%s5778_s6 + $0x338] sm:$0xff] }
  0x8c   :  { %2014 = vmatprep.mubr.bf16.mxu0 %v4142_v63  ;;  %v2574_v34 = vld [vmem:[%s5778_s6 + $0x330] sm:$0xff]  ;;  %v2577_v36 = vld [vmem:[%s5778_s6 + $0x348] sm:$0xff]  ;;  %v2576_v37 = vld [vmem:[%s5778_s6 + $0x340] sm:$0xff] }
  0x8d   :  { %v4798_v5 = vpop.permute.xlu0 %200  ;;  %v4806_v8 = vpop.permute.xlu1 %205  ;;  %v2579_v39 = vld [vmem:[%s5778_s6 + $0x358] sm:$0xff]  ;;  %v2578_v40 = vld [vmem:[%s5778_s6 + $0x350] sm:$0xff]  ;;  %v2581_v43 = vld [vmem:[%s5778_s6 + $0x368] sm:$0xff] }
  0x8e   :  { %1343 = vperm.xlu1 %4103, %v1303_v44   ;;  %1338 = vperm.xlu0 %4102, %v1302_v45   ;;  %v2580_v44 = vld [vmem:[%s5778_s6 + $0x360] sm:$0xff] }
  0x91   :  { %v4814_v11 = vpop.permute.xlu0 %210  ;;  %v4816_v12 = vpop.permute.xlu1 %215 }
  0x92   :  { %1353 = vperm.xlu1 %4103, %v1305_v46   ;;  %1348 = vperm.xlu0 %4102, %v1304_v47   ;;  %v2583_v46 = vld [vmem:[%s5778_s6 + $0x378] sm:$0xff]  ;;  %v2582_v47 = vld [vmem:[%s5778_s6 + $0x370] sm:$0xff] }
  0x95   :  { %v4824_v15 = vpop.permute.xlu0 %220  ;;  %v4832_v18 = vpop.permute.xlu1 %225 }
  0x96   :  { %1433 = vperm.xlu1 %4103, %v1321_v48   ;;  %1428 = vperm.xlu0 %4102, %v1320_v49  }
  0x99   :  { %v4840_v21 = vpop.permute.xlu0 %230  ;;  %v4842_v22 = vpop.permute.xlu1 %235 }
  0x9a   :  { %1363 = vperm.xlu1 %4103, %v1307_v50   ;;  %1358 = vperm.xlu0 %4102, %v1306_v51  }
  0x9d   :  { %v4850_v25 = vpop.permute.xlu0 %240  ;;  %v4858_v28 = vpop.permute.xlu1 %245 }
  0x9e   :  { %1443 = vperm.xlu1 %4103, %v1323_v54   ;;  %1438 = vperm.xlu0 %4102, %v1322_v55   ;;  %v2585_v54 = vld [vmem:[%s5778_s6 + $0x388] sm:$0xff]  ;;  %v2584_v55 = vld [vmem:[%s5778_s6 + $0x380] sm:$0xff] }
  0xa1   :  { %v4866_v31 = vpop.permute.xlu0 %250  ;;  %v4868_v32 = vpop.permute.xlu1 %255 }
  0xa2   :  { %1373 = vperm.xlu1 %4103, %v1309_v57   ;;  %1368 = vperm.xlu0 %4102, %v1308_v58  }
  0xa5   :  { %v4876_v35 = vpop.permute.xlu0 %260  ;;  %v4884_v38 = vpop.permute.xlu1 %265 }
  0xa6   :  { %1453 = vperm.xlu1 %4103, %v1325_v60   ;;  %1448 = vperm.xlu0 %4102, %v1324_v61  }
  0xa9   :  { %v4892_v41 = vpop.permute.xlu0 %270  ;;  %v4894_v42 = vpop.permute.xlu1 %275 }
  0xaa   :  { %1383 = vperm.xlu1 %4103, %v1311_v3   ;;  %1378 = vperm.xlu0 %4102, %v1310_v4  }
  0xad   :  { %v4902_v45 = vpop.permute.xlu0 %280  ;;  %v4910_v48 = vpop.permute.xlu1 %285 }
  0xae   :  { %1463 = vperm.xlu1 %4103, %v1327_v6   ;;  %1458 = vperm.xlu0 %4102, %v1326_v7   ;;  %v2587_v6 = vld [vmem:[%s5778_s6 + $0x398] sm:$0xff]  ;;  %v2586_v7 = vld [vmem:[%s5778_s6 + $0x390] sm:$0xff] }
  0xb1   :  { %v4919_v57 = vpop.permute.xlu0 %290  ;;  %v4923_v63 = vpop.permute.xlu1 %295 }
  0xb2   :  { %1393 = vperm.xlu1 %4103, %v1313_v9   ;;  %1388 = vperm.xlu0 %4102, %v1312_v10  }
  0xb5   :  { %v4932_v10 = vpop.permute.xlu0 %300 }
  0xb6   :  { %1473 = vperm.xlu1 %4103, %v1329_v13   ;;  %1468 = vperm.xlu0 %4102, %v1328_v14  }
  0xba   :  { %1403 = vperm.xlu1 %4103, %v1315_v16   ;;  %1398 = vperm.xlu0 %4102, %v1314_v17   ;;  %v2589_v17 = vld [vmem:[%s5778_s6 + $0x3a8] sm:$0xff] }
  0xbe   :  { %1483 = vperm.xlu1 %4103, %v1331_v19   ;;  %1478 = vperm.xlu0 %4102, %v1330_v20   ;;  %v2588_v19 = vld [vmem:[%s5778_s6 + $0x3a0] sm:$0xff]  ;;  %v4941_v20 = vpop.permute.xlu1 %305 }
  0xc2   :  { %1413 = vperm.xlu1 %4103, %v1317_v23   ;;  %1408 = vperm.xlu0 %4102, %v1316_v24  }
  0xc6   :  { %1493 = vperm.xlu1 %4103, %v1333_v26   ;;  %1488 = vperm.xlu0 %4102, %v1332_v27  }
  0xca   :  { %1503 = vperm.xlu1 %4103, %v1335_v29   ;;  %1498 = vperm.xlu0 %4102, %v1334_v30  }
  0xce   :  { %2598 = vperm.xlu1 %4103, %v2575_v33   ;;  %2593 = vperm.xlu0 %4102, %v2574_v34   ;;  %v3077_v33 = vld [vmem:[%s5778_s6 + $0x3b8] sm:$0xff] }
  0xd2   :  { %2608 = vperm.xlu1 %4103, %v2577_v36   ;;  %2603 = vperm.xlu0 %4102, %v2576_v37  }
  0xd6   :  { %2618 = vperm.xlu1 %4103, %v2579_v39   ;;  %2613 = vperm.xlu0 %4102, %v2578_v40  }
  0xda   :  { %2628 = vperm.xlu1 %4103, %v2581_v43   ;;  %2623 = vperm.xlu0 %4102, %v2580_v44  }
  0xde   :  { %2638 = vperm.xlu1 %4103, %v2583_v46   ;;  %2633 = vperm.xlu0 %4102, %v2582_v47   ;;  %v3738_v49 = vpop.f32.mrb[0].mxu0  ;;  %v3079_v46 = vld [vmem:[%s5778_s6 + $0x3c8] sm:$0xff]  ;;  %v3078_v47 = vld [vmem:[%s5778_s6 + $0x3c0] sm:$0xff] }
  0xdf   :  { %v836_v50 = vadd.f32 %v3738_v49, %v4758_v53  ;;  %v827_v51 = vpop.f32.mrb[1].mxu0 }
  0xe0   :  { %v3739_v58 = vpop.f32.mrb[2].mxu0  ;;  %v828_v60 = vadd.f32 %v827_v51, %v4756_v52 }
  0xe1   :  { %v839_v61 = vadd.f32 %v3739_v58, %v4774_v59  ;;  %v830_v0 = vpop.f32.mrb[3].mxu0  ;;  %v1100_v53 = vmax.f32 %v836_v50, 0.0 }
  0xe2   :  { %2648 = vperm.xlu1 %4103, %v2585_v54   ;;  %2643 = vperm.xlu0 %4102, %v2584_v55   ;;  %v831_v4 = vadd.f32 %v830_v0, %v4766_v56  ;;  %v1098_v52 = vmax.f32 %v828_v60, 0.0 }
  0xe3   :  { %v1101_v3 = vmax.f32 %v839_v61, 0.0 }
  0xe4   :  { %v1099_v59 = vmax.f32 %v831_v4, 0.0 }
  0xe5   :  { %v1167_v9 = vpack.c.bf16 %v1101_v3, %v1100_v53 }
  0xe6   :  { %2658 = vperm.xlu1 %4103, %v2587_v6   ;;  %2653 = vperm.xlu0 %4102, %v2586_v7   ;;  %v3742_v13 = vpop.f32.mrb[4].mxu0  ;;  %v1166_v14 = vpack.c.bf16 %v1099_v59, %v1098_v52  ;;  %v3081_v52 = vld [vmem:[%s5778_s6 + $0x3d8] sm:$0xff] }
  0xe7   :  { %v852_v16 = vadd.f32 %v3742_v13, %v4798_v5  ;;  %v843_v56 = vpop.f32.mrb[5].mxu0 }
  0xe8   :  { %v3743_v23 = vpop.f32.mrb[6].mxu0  ;;  %v844_v24 = vadd.f32 %v843_v56, %v4782_v62  ;;  %1983 = vmatpush1.bf16.msra.mxu0 %v1166_v14  ;;  %3930 = vmatpush1.bf16.msra.mxu1 %v1166_v14  ;;  %v2590_v62 = vld [vmem:[%s5778_s6 + $0x3b0] sm:$0xff] }
  0xe9   :  { %v855_v26 = vadd.f32 %v3743_v23, %v4806_v8  ;;  %v846_v27 = vpop.f32.mrb[7].mxu0  ;;  %v1104_v5 = vmax.f32 %v852_v16, 0.0  ;;  %1984 = vmatprep.subr.bf16.mxu0 %v4332_v2  ;;  %3915 = vmatprep.subr.bf16.mxu1 %v4332_v2  ;;  %v4954_v8 = vpop.permute.xlu0 %310 }
  0xea   :  { %2668 = vperm.xlu1 %4103, %v2589_v17   ;;  %2663 = vperm.xlu0 %4102, %v2588_v19   ;;  %v847_v30 = vadd.f32 %v846_v27, %v4790_v1  ;;  %v1102_v34 = vmax.f32 %v844_v24, 0.0  ;;  %v4956_v1 = vpop.permute.xlu1 %315 }
  0xeb   :  { %v1105_v29 = vmax.f32 %v855_v26, 0.0 }
  0xec   :  { %v1103_v37 = vmax.f32 %v847_v30, 0.0  ;;  %1985 = vmatpush1.bf16.msra.mxu0 %v1167_v9  ;;  %3931 = vmatpush1.bf16.msra.mxu1 %v1167_v9  ;;  %v3275_v9 = vld [vmem:[%s5777_s5 + $0x8] sm:$0xff] }
  0xed   :  { %v1169_v36 = vpack.c.bf16 %v1105_v29, %v1104_v5  ;;  %1986 = vmatprep.subr.bf16.mxu0 %v4332_v2  ;;  %3916 = vmatprep.subr.bf16.mxu1 %v4332_v2 }
  0xee   :  { %3088 = vperm.xlu1 %4103, %v3077_v33   ;;  %2673 = vperm.xlu0 %4102, %v2590_v62   ;;  %v3746_v39 = vpop.f32.mrb[8].mxu0  ;;  %v1168_v40 = vpack.c.bf16 %v1103_v37, %v1102_v34  ;;  %v4980_v61 = vpop.permute.xlu1 %325  ;;  %v3083_v62 = vld [vmem:[%s5778_s6 + $0x3e8] sm:$0xff]  ;;  %v3277_v34 = vld [vmem:[%s5777_s5 + $0x18] sm:$0xff] }
  0xef   :  { %v868_v43 = vadd.f32 %v3746_v39, %v4824_v15  ;;  %v859_v44 = vpop.f32.mrb[9].mxu0  ;;  %v4969_v15 = vpop.permute.xlu0 %320 }
  0xf0   :  { %v3747_v49 = vpop.f32.mrb[10].mxu0  ;;  %v860_v50 = vadd.f32 %v859_v44, %v4814_v11  ;;  %1987 = vmatpush1.bf16.msra.mxu0 %v1168_v40  ;;  %3932 = vmatpush1.bf16.msra.mxu1 %v1168_v40  ;;  %v3274_v11 = vld [vmem:[%s5777_s5] sm:$0xff] }
  0xf1   :  { %v871_v51 = vadd.f32 %v3747_v49, %v4832_v18  ;;  %v862_v54 = vpop.f32.mrb[11].mxu0  ;;  %v1108_v55 = vmax.f32 %v868_v43, 0.0  ;;  %1988 = vmatprep.subr.bf16.mxu0 %v4332_v2  ;;  %3917 = vmatprep.subr.bf16.mxu1 %v4332_v2  ;;  %v3080_v18 = vld [vmem:[%s5778_s6 + $0x3d0] sm:$0xff] }
  0xf2   :  { %3098 = vperm.xlu1 %4103, %v3079_v46   ;;  %3093 = vperm.xlu0 %4102, %v3078_v47   ;;  %v863_v60 = vadd.f32 %v862_v54, %v4816_v12  ;;  %v1106_v0 = vmax.f32 %v860_v50, 0.0  ;;  %v4995_v16 = vpop.permute.xlu1 %335  ;;  %v3084_v47 = vld [vmem:[%s5778_s6 + $0x3f0] sm:$0xff] }
  0xf3   :  { %v1109_v58 = vmax.f32 %v871_v51, 0.0  ;;  %v4991_v59 = vpop.permute.xlu0 %330 }
  0xf4   :  { %v1107_v3 = vmax.f32 %v863_v60, 0.0  ;;  %1989 = vmatpush1.bf16.msra.mxu0 %v1169_v36  ;;  %3933 = vmatpush1.bf16.msra.mxu1 %v1169_v36 }
  0xf5   :  { %v1171_v53 = vpack.c.bf16 %v1109_v58, %v1108_v55  ;;  %1990 = vmatprep.subr.bf16.mxu0 %v4332_v2  ;;  %3918 = vmatprep.subr.bf16.mxu1 %v4332_v2 }
  0xf6   :  { %3285 = vperm.xlu1 %4103, %v3274_v11   ;;  %3103 = vperm.xlu0 %4102, %v3080_v18   ;;  %v3750_v12 = vpop.f32.mrb[12].mxu0  ;;  %v1170_v4 = vpack.c.bf16 %v1107_v3, %v1106_v0  ;;  %v5017_v36 = vpop.permute.xlu1 %345  ;;  %v3085_v11 = vld [vmem:[%s5778_s6 + $0x3f8] sm:$0xf]  ;;  %v3279_v18 = vld [vmem:[%s5777_s5 + $0x28] sm:$0xff] }
  0xf7   :  { %v884_v6 = vadd.f32 %v3750_v12, %v4850_v25  ;;  %v875_v7 = vpop.f32.mrb[13].mxu0  ;;  %v5006_v5 = vpop.permute.xlu0 %340 }
  0xf8   :  { %v3751_v13 = vpop.f32.mrb[14].mxu0  ;;  %v876_v14 = vadd.f32 %v875_v7, %v4840_v21  ;;  %1991 = vmatpush1.bf16.msra.mxu0 %v1170_v4  ;;  %3934 = vmatpush1.bf16.msra.mxu1 %v1170_v4  ;;  %v3082_v21 = vld [vmem:[%s5778_s6 + $0x3e0] sm:$0xff] }
  0xf9   :  { %v887_v25 = vadd.f32 %v3751_v13, %v4858_v28  ;;  %v878_v56 = vpop.f32.mrb[15].mxu0  ;;  %v1112_v17 = vmax.f32 %v884_v6, 0.0  ;;  %1992 = vmatprep.subr.bf16.mxu0 %v4332_v2  ;;  %3919 = vmatprep.subr.bf16.mxu1 %v4332_v2  ;;  %v3276_v28 = vld [vmem:[%s5777_s5 + $0x10] sm:$0xff] }
  0xfa   :  { %3108 = vperm.xlu1 %4103, %v3081_v52   ;;  %3290 = vperm.xlu0 %4102, %v3275_v9   ;;  %v879_v23 = vadd.f32 %v878_v56, %v4842_v22  ;;  %v1110_v24 = vmax.f32 %v876_v14, 0.0 }
  0xfb   :  { %v1113_v19 = vmax.f32 %v887_v25, 0.0 }
  0xfc   :  { %v1111_v27 = vmax.f32 %v879_v23, 0.0  ;;  %1993 = vmatpush1.bf16.msra.mxu0 %v1171_v53  ;;  %3935 = vmatpush1.bf16.msra.mxu1 %v1171_v53  ;;  %v3282_v23 = vld [vmem:[%s5777_s5 + $0x40] sm:$0xf] }
  0xfd   :  { %v1173_v26 = vpack.c.bf16 %v1113_v19, %v1112_v17  ;;  %1994 = vmatprep.subr.bf16.mxu0 %v4332_v2  ;;  %3920 = vmatprep.subr.bf16.mxu1 %v4332_v2  ;;  %v3352_v19 = vld [vmem:[%s5778_s6 + $0x400] sm:$0x1] }
  0xfe   :  { %3113 = vperm.xlu1 %4103, %v3082_v21   ;;  %3295 = vperm.xlu0 %4102, %v3276_v28   ;;  %v3754_v22 = vpop.f32.mrb[16].mxu0  ;;  %v1172_v29 = vpack.c.bf16 %v1111_v27, %v1110_v24 }
  0xff   :  { %v900_v30 = vadd.f32 %v3754_v22, %v4876_v35  ;;  %v891_v33 = vpop.f32.mrb[17].mxu0 }
 0x100   :  { %v3755_v37 = vpop.f32.mrb[18].mxu0  ;;  %v892_v39 = vadd.f32 %v891_v33, %v4866_v31  ;;  %1995 = vmatpush1.bf16.msra.mxu0 %v1172_v29  ;;  %3936 = vmatpush1.bf16.msra.mxu1 %v1172_v29  ;;  %v3278_v31 = vld [vmem:[%s5777_s5 + $0x20] sm:$0xff] }
 0x101   :  { %v903_v35 = vadd.f32 %v3755_v37, %v4884_v38  ;;  %v894_v40 = vpop.f32.mrb[19].mxu0  ;;  %v1116_v43 = vmax.f32 %v900_v30, 0.0  ;;  %1996 = vmatprep.subr.bf16.mxu0 %v4332_v2  ;;  %3921 = vmatprep.subr.bf16.mxu1 %v4332_v2  ;;  %v5030_v38 = vpop.permute.xlu0 %350 }
 0x102   :  { %3118 = vperm.xlu1 %4103, %v3083_v62   ;;  %3300 = vperm.xlu0 %4102, %v3277_v34   ;;  %v895_v46 = vadd.f32 %v894_v40, %v4868_v32  ;;  %v1114_v49 = vmax.f32 %v892_v39, 0.0  ;;  %v5032_v32 = vpop.permute.xlu1 %355 }
 0x103   :  { %v1117_v44 = vmax.f32 %v903_v35, 0.0 }
 0x104   :  { %v1115_v51 = vmax.f32 %v895_v46, 0.0  ;;  %1997 = vmatpush1.bf16.msra.mxu0 %v1173_v26  ;;  %3937 = vmatpush1.bf16.msra.mxu1 %v1173_v26 }
 0x105   :  { %v1175_v50 = vpack.c.bf16 %v1117_v44, %v1116_v43  ;;  %1998 = vmatprep.subr.bf16.mxu0 %v4332_v2  ;;  %3922 = vmatprep.subr.bf16.mxu1 %v4332_v2 }
 0x106   :  { %3123 = vperm.xlu1 %4103, %v3084_v47   ;;  %3305 = vperm.xlu0 %4102, %v3278_v31   ;;  %v3758_v54 = vpop.f32.mrb[20].mxu0  ;;  %v1174_v55 = vpack.c.bf16 %v1115_v51, %v1114_v49  ;;  %v5056_v52 = vpop.permute.xlu1 %365 }
 0x107   :  { %v916_v58 = vadd.f32 %v3758_v54, %v4902_v45  ;;  %v907_v60 = vpop.f32.mrb[21].mxu0  ;;  %v5045_v45 = vpop.permute.xlu0 %360 }
 0x108   :  { %v3759_v0 = vpop.f32.mrb[22].mxu0  ;;  %v908_v53 = vadd.f32 %v907_v60, %v4892_v41  ;;  %1999 = vmatpush1.bf16.msra.mxu0 %v1174_v55  ;;  %3938 = vmatpush1.bf16.msra.mxu1 %v1174_v55  ;;  %v3281_v41 = vld [vmem:[%s5777_s5 + $0x38] sm:$0xff] }
 0x109   :  { %v919_v3 = vadd.f32 %v3759_v0, %v4910_v48  ;;  %v910_v12 = vpop.f32.mrb[23].mxu0  ;;  %v1120_v4 = vmax.f32 %v916_v58, 0.0  ;;  %2000 = vmatprep.subr.bf16.mxu0 %v4332_v2  ;;  %3923 = vmatprep.subr.bf16.mxu1 %v4332_v2  ;;  %v3280_v48 = vld [vmem:[%s5777_s5 + $0x30] sm:$0xff] }
 0x10a   :  { %3128 = vperm.xlu1 %4103, %v3085_v11   ;;  %3310 = vperm.xlu0 %4102, %v3279_v18   ;;  %v911_v7 = vadd.f32 %v910_v12, %v4894_v42  ;;  %v1118_v9 = vmax.f32 %v908_v53, 0.0  ;;  %v5071_v26 = vpop.permute.xlu1 %375 }
 0x10b   :  { %v1121_v6 = vmax.f32 %v919_v3, 0.0  ;;  %v5067_v21 = vpop.permute.xlu0 %370 }
 0x10c   :  { %v1119_v14 = vmax.f32 %v911_v7, 0.0  ;;  %2001 = vmatpush1.bf16.msra.mxu0 %v1175_v50  ;;  %3939 = vmatpush1.bf16.msra.mxu1 %v1175_v50 }
 0x10d   :  { %v1177_v13 = vpack.c.bf16 %v1121_v6, %v1120_v4  ;;  %2002 = vmatprep.subr.bf16.mxu0 %v4332_v2  ;;  %3924 = vmatprep.subr.bf16.mxu1 %v4332_v2 }
 0x10e   :  { %3320 = vperm.xlu1 %4103, %v3281_v41   ;;  %3315 = vperm.xlu0 %4102, %v3280_v48   ;;  %v3762_v42 = vpop.f32.mrb[24].mxu0  ;;  %v1176_v25 = vpack.c.bf16 %v1119_v14, %v1118_v9  ;;  %v5081_v35 = vpop.permute.xlu1 %385  ;;  %v4146_v48 = vld [vmem:[%s5774_s2 + $0x2c] ss:$20 sps:$4 sm:$0xff]   ;;  %v4148_v9 = vld [vmem:[%s5774_s2 + $0x194] ss:$20 sps:$4 sm:$0xff]  }
 0x10f   :  { %v932_v56 = vadd.f32 %v3762_v42, %v4932_v10  ;;  %v923_v17 = vpop.f32.mrb[25].mxu0 }
 0x110   :  { %v3763_v28 = vpop.f32.mrb[26].mxu0  ;;  %v924_v24 = vadd.f32 %v923_v17, %v4919_v57  ;;  %2003 = vmatpush1.bf16.msra.mxu0 %v1176_v25  ;;  %3940 = vmatpush1.bf16.msra.mxu1 %v1176_v25 }
 0x111   :  { %v935_v10 = vadd.f32 %v3763_v28, %v4941_v20  ;;  %v926_v27 = vpop.f32.mrb[27].mxu0  ;;  %v1124_v22 = vmax.f32 %v932_v56, 0.0  ;;  %2004 = vmatprep.subr.bf16.mxu0 %v4332_v2  ;;  %3925 = vmatprep.subr.bf16.mxu1 %v4332_v2  ;;  %v5076_v20 = vpop.permute.xlu0 %380 }
 0x112   :  { %3355 = vperm.xlu1 %4103, %v3352_v19   ;;  %3325 = vperm.xlu0 %4102, %v3282_v23   ;;  %v927_v30 = vadd.f32 %v926_v27, %v4923_v63  ;;  %v1122_v33 = vmax.f32 %v924_v24, 0.0  ;;  %v4150_v27 = vld [vmem:[%s5774_s2 + $0x28] ss:$20 sps:$4 sm:$0xff]  }
 0x113   :  { %v1125_v29 = vmax.f32 %v935_v10, 0.0 }
 0x114   :  { %v1123_v57 = vmax.f32 %v927_v30, 0.0  ;;  %2005 = vmatpush1.bf16.msra.mxu0 %v1177_v13  ;;  %3941 = vmatpush1.bf16.msra.mxu1 %v1177_v13  ;;  %v4152_v30 = vld [vmem:[%s5774_s2 + $0x54] ss:$20 sps:$4 sm:$0xff]  }
 0x115   :  { %v1179_v62 = vpack.c.bf16 %v1125_v29, %v1124_v22  ;;  %2006 = vmatprep.subr.bf16.mxu0 %v4332_v2  ;;  %3926 = vmatprep.subr.bf16.mxu1 %v4332_v2 }
 0x116   :  { %v3766_v34 = vpop.f32.mrb[28].mxu0  ;;  %v1178_v37 = vpack.c.bf16 %v1123_v57, %v1122_v33 }
 0x117   :  { %v948_v39 = vadd.f32 %v3766_v34, %v4969_v15  ;;  %v939_v63 = vpop.f32.mrb[29].mxu0  ;;  %v5088_v15 = vpop.permute.xlu0 %390 }
 0x118   :  { %v3767_v40 = vpop.f32.mrb[30].mxu0  ;;  %v940_v43 = vadd.f32 %v939_v63, %v4954_v8  ;;  %2007 = vmatpush1.bf16.msra.mxu0 %v1178_v37  ;;  %3942 = vmatpush1.bf16.msra.mxu1 %v1178_v37  ;;  %v5090_v8 = vpop.permute.xlu1 %395 }
 0x119   :  { %v951_v44 = vadd.f32 %v3767_v40, %v4980_v61  ;;  %v942_v46 = vpop.f32.mrb[31].mxu0  ;;  %2008 = vmatprep.subr.bf16.mxu0 %v4332_v2  ;;  %3927 = vmatprep.subr.bf16.mxu1 %v4332_v2  ;;  %v1128_v47 = vmax.f32 %v948_v39, 0.0 }
 0x11a   :  { %v943_v49 = vadd.f32 %v942_v46, %v4956_v1  ;;  %v1126_v50 = vmax.f32 %v940_v43, 0.0 }
 0x11b   :  { %v1129_v31 = vmax.f32 %v951_v44, 0.0  ;;  %v5097_v0 = vpop.permute.xlu0 %400 }
 0x11c   :  { %v1127_v54 = vmax.f32 %v943_v49, 0.0  ;;  %2009 = vmatpush1.bf16.msra.mxu0 %v1179_v62  ;;  %3943 = vmatpush1.bf16.msra.mxu1 %v1179_v62  ;;  %v4156_v49 = vld [vmem:[%s5774_s2 + $0x50] ss:$20 sps:$4 sm:$0xff]  }
 0x11d   :  { %v1181_v51 = vpack.c.bf16 %v1129_v31, %v1128_v47  ;;  %2010 = vmatprep.subr.bf16.mxu0 %v4332_v2  ;;  %3928 = vmatprep.subr.bf16.mxu1 %v4332_v2 }
 0x11e   :  { %v3770_v61 = vpop.f32.mrb[32].mxu0  ;;  %v1180_v55 = vpack.c.bf16 %v1127_v54, %v1126_v50  ;;  %v4158_v54 = vld [vmem:[%s5774_s2 + $0x7c] ss:$20 sps:$4 sm:$0xff]  }
 0x11f   :  { %v964_v58 = vadd.f32 %v3770_v61, %v5006_v5  ;;  %v955_v60 = vpop.f32.mrb[33].mxu0  ;;  %v5102_v5 = vpop.permute.xlu1 %405 }
 0x120   :  { %v3771_v11 = vpop.f32.mrb[34].mxu0  ;;  %v956_v1 = vadd.f32 %v955_v60, %v4991_v59  ;;  %2011 = vmatpush1.bf16.msra.mxu0 %v1180_v55  ;;  %3944 = vmatpush1.bf16.msra.mxu1 %v1180_v55  ;;  %v4140_v59 = vld [vmem:[%s5774_s2] ss:$20 sps:$4 sm:$0xff]   ;;  %v5118_v25 = vpop.permute.xlu0 %410  ;;  %v4160_v55 = vld [vmem:[%s5774_s2 + $0x1e4] ss:$20 sps:$4 sm:$0xff]  }
 0x121   :  { %v967_v18 = vadd.f32 %v3771_v11, %v5017_v36  ;;  %v958_v53 = vpop.f32.mrb[35].mxu0  ;;  %2012 = vmatprep.subr.bf16.mxu0 %v4332_v2  ;;  %3929 = vmatprep.subr.bf16.mxu1 %v4332_v2  ;;  %v1132_v3 = vmax.f32 %v964_v58, 0.0  ;;  %v4143_v36 = vld [vmem:[%s5774_s2 + $0x168] ss:$20 sps:$4 sm:$0xff]  }
 0x122   :  { %v959_v4 = vadd.f32 %v958_v53, %v4995_v16  ;;  %v1130_v6 = vmax.f32 %v956_v1, 0.0 }
 0x123   :  { %v1133_v12 = vmax.f32 %v967_v18, 0.0  ;;  %v5122_v23 = vpop.permute.xlu1 %415 }
 0x124   :  { %v1131_v41 = vmax.f32 %v959_v4, 0.0  ;;  %2013 = vmatpush1.bf16.msra.mxu0 %v1181_v51  ;;  %3945 = vmatpush1.bf16.msra.mxu1 %v1181_v51  ;;  %v421_v33 = vpop.permute.xlu0 %420 }
 0x125   :  { %v1183_v7 = vpack.c.bf16 %v1133_v12, %v1132_v3  ;;  %2151 = vmatprep.subr.bf16.mxu1 %v4332_v2 }
 0x126   :  { %v3774_v16 = vpop.f32.mrb[36].mxu0  ;;  %v1182_v13 = vpack.c.bf16 %v1131_v41, %v1130_v6  ;;  %v4162_v6 = vld [vmem:[%s5774_s2 + $0x78] ss:$20 sps:$4 sm:$0xff]  }
 0x127   :  { %v980_v14 = vadd.f32 %v3774_v16, %v5045_v45  ;;  %v971_v42 = vpop.f32.mrb[37].mxu0  ;;  %2015 = vmatmul.mubr.bf16.vlgmr.msra.gmra.mrb[68].mxu0 %v4140_v59  ;;  %2087 = vmatmul.mubr.bf16.vlgmr.msra.gmra.mrb[0].mxu1 %v4143_v36  ;;  %v426_v39 = vpop.permute.xlu1 %425 }
 0x128   :  { %v3775_v56 = vpop.f32.mrb[38].mxu0  ;;  %v972_v17 = vadd.f32 %v971_v42, %v5030_v38  ;;  %2152 = vmatpush1.bf16.msra.mxu1 %v1182_v13  ;;  %2022 = vmatprep.mubr.bf16.mxu0 %v4146_v48  ;;  %v4151_v38 = vld [vmem:[%s5774_s2 + $0x190] ss:$20 sps:$4 sm:$0xff]  }
 0x129   :  { %v983_v19 = vadd.f32 %v3775_v56, %v5056_v52  ;;  %v974_v28 = vpop.f32.mrb[39].mxu0  ;;  %2153 = vmatprep.subr.bf16.mxu1 %v4332_v2  ;;  %2094 = vmatprep.mubr.bf16.mxu1 %v4148_v9  ;;  %v1136_v24 = vmax.f32 %v980_v14, 0.0  ;;  %v4164_v48 = vld [vmem:[%s5774_s2 + $0xa4] ss:$20 sps:$4 sm:$0xff]  }
 0x12a   :  { %v975_v10 = vadd.f32 %v974_v28, %v5032_v32  ;;  %v1134_v52 = vmax.f32 %v972_v17, 0.0  ;;  %v4154_v32 = vld [vmem:[%s5774_s2 + $0x1bc] ss:$20 sps:$4 sm:$0xff]  }
 0x12b   :  { %v1137_v45 = vmax.f32 %v983_v19, 0.0  ;;  %v5155_v61 = vpop.permute.xlu1 %435 }
 0x12c   :  { %v1135_v29 = vmax.f32 %v975_v10, 0.0  ;;  %2154 = vmatpush1.bf16.msra.mxu1 %v1183_v7 }
 0x12d   :  { %v1185_v22 = vpack.c.bf16 %v1137_v45, %v1136_v24  ;;  %2155 = vmatprep.subr.bf16.mxu1 %v4332_v2 }
 0x12e   :  { %v3778_v62 = vpop.f32.mrb[40].mxu0  ;;  %v1184_v57 = vpack.c.bf16 %v1135_v29, %v1134_v52 }
 0x12f   :  { %v996_v34 = vadd.f32 %v3778_v62, %v5076_v20  ;;  %v987_v37 = vpop.f32.mrb[41].mxu0  ;;  %2023 = vmatmul.mubr.bf16.gmra.mrb[72].mxu0 %v4150_v27  ;;  %2095 = vmatmul.mubr.bf16.gmra.mrb[4].mxu1 %v4151_v38  ;;  %v5144_v20 = vpop.permute.xlu0 %430  ;;  %v4168_v38 = vld [vmem:[%s5774_s2 + $0xa0] ss:$20 sps:$4 sm:$0xff]  }
 0x130   :  { %v3779_v63 = vpop.f32.mrb[42].mxu0  ;;  %v988_v40 = vadd.f32 %v987_v37, %v5067_v21  ;;  %2156 = vmatpush1.bf16.msra.mxu1 %v1184_v57  ;;  %2030 = vmatprep.mubr.bf16.mxu0 %v4152_v30  ;;  %v4157_v21 = vld [vmem:[%s5774_s2 + $0x1b8] ss:$20 sps:$4 sm:$0xff]  }
 0x131   :  { %v999_v43 = vadd.f32 %v3779_v63, %v5081_v35  ;;  %v990_v44 = vpop.f32.mrb[43].mxu0  ;;  %2157 = vmatprep.subr.bf16.mxu1 %v4332_v2  ;;  %2102 = vmatprep.mubr.bf16.mxu1 %v4154_v32  ;;  %v1140_v46 = vmax.f32 %v996_v34, 0.0  ;;  %v4170_v30 = vld [vmem:[%s5774_s2 + $0xcc] ss:$20 sps:$4 sm:$0xff]  }
 0x132   :  { %v991_v31 = vadd.f32 %v990_v44, %v5071_v26  ;;  %v1138_v35 = vmax.f32 %v988_v40, 0.0 }
 0x133   :  { %v1141_v47 = vmax.f32 %v999_v43, 0.0  ;;  %v441_v3 = vpop.permute.xlu0 %440 }
 0x134   :  { %v1139_v51 = vmax.f32 %v991_v31, 0.0  ;;  %2158 = vmatpush1.bf16.msra.mxu1 %v1185_v22 }
 0x135   :  { %v1187_v50 = vpack.c.bf16 %v1141_v47, %v1140_v46  ;;  %2159 = vmatprep.subr.bf16.mxu1 %v4332_v2 }
 0x136   :  { %v3782_v26 = vpop.f32.mrb[44].mxu0  ;;  %v1186_v58 = vpack.c.bf16 %v1139_v51, %v1138_v35  ;;  %v4176_v51 = vld [vmem:[%s5774_s2 + $0xf4] ss:$20 sps:$4 sm:$0xff]  }
 0x137   :  { %v1012_v60 = vadd.f32 %v3782_v26, %v5097_v0  ;;  %v1003_v11 = vpop.f32.mrb[45].mxu0  ;;  %2031 = vmatmul.mubr.bf16.gmra.mrb[76].mxu0 %v4156_v49  ;;  %2103 = vmatmul.mubr.bf16.gmra.mrb[8].mxu1 %v4157_v21  ;;  %v446_v0 = vpop.permute.xlu1 %445  ;;  %v4174_v49 = vld [vmem:[%s5774_s2 + $0xc8] ss:$20 sps:$4 sm:$0xff]  }
 0x138   :  { %v3783_v1 = vpop.f32.mrb[46].mxu0  ;;  %v1004_v18 = vadd.f32 %v1003_v11, %v5088_v15  ;;  %2160 = vmatpush1.bf16.msra.mxu1 %v1186_v58  ;;  %2038 = vmatprep.mubr.bf16.mxu0 %v4158_v54  ;;  %v4163_v15 = vld [vmem:[%s5774_s2 + $0x1e0] ss:$20 sps:$4 sm:$0xff]   ;;  %v451_v42 = vpop.permute.xlu0 %450 }
 0x139   :  { %v1015_v53 = vadd.f32 %v3783_v1, %v5102_v5  ;;  %v1006_v12 = vpop.f32.mrb[47].mxu0  ;;  %2161 = vmatprep.subr.bf16.mxu1 %v4332_v2  ;;  %2110 = vmatprep.mubr.bf16.mxu1 %v4160_v55  ;;  %v1144_v4 = vmax.f32 %v1012_v60, 0.0 }
 0x13a   :  { %v1007_v36 = vadd.f32 %v1006_v12, %v5090_v8  ;;  %v1142_v5 = vmax.f32 %v1004_v18, 0.0  ;;  %v4166_v8 = vld [vmem:[%s5774_s2 + $0x20c] ss:$20 sps:$4 sm:$0xff]  }
 0x13b   :  { %v1145_v59 = vmax.f32 %v1015_v53, 0.0  ;;  %v5180_v28 = vpop.permute.xlu1 %455 }
 0x13c   :  { %v1143_v41 = vmax.f32 %v1007_v36, 0.0  ;;  %2162 = vmatpush1.bf16.msra.mxu1 %v1187_v50 }
 0x13d   :  { %v1189_v7 = vpack.c.bf16 %v1145_v59, %v1144_v4  ;;  %2163 = vmatprep.subr.bf16.mxu1 %v4332_v2 }
 0x13e   :  { %v3786_v16 = vpop.f32.mrb[48].mxu0  ;;  %v1188_v9 = vpack.c.bf16 %v1143_v41, %v1142_v5  ;;  %v4182_v41 = vld [vmem:[%s5774_s2 + $0x11c] ss:$20 sps:$4 sm:$0xff]  }
 0x13f   :  { %v1028_v13 = vadd.f32 %v3786_v16, %v421_v33  ;;  %v1019_v14 = vpop.f32.mrb[49].mxu0  ;;  %2039 = vmatmul.mubr.bf16.gmra.mrb[80].mxu0 %v4162_v6  ;;  %2111 = vmatmul.mubr.bf16.gmra.mrb[12].mxu1 %v4163_v15  ;;  %v461_v33 = vpop.permute.xlu0 %460  ;;  %v4181_v6 = vld [vmem:[%s5774_s2 + $0x258] ss:$20 sps:$4 sm:$0xff]  }
 0x140   :  { %v3787_v56 = vpop.f32.mrb[50].mxu0  ;;  %v1020_v17 = vadd.f32 %v1019_v14, %v5118_v25  ;;  %2164 = vmatpush1.bf16.msra.mxu1 %v1188_v9  ;;  %2046 = vmatprep.mubr.bf16.mxu0 %v4164_v48  ;;  %v4169_v25 = vld [vmem:[%s5774_s2 + $0x208] ss:$20 sps:$4 sm:$0xff]   ;;  %v466_v37 = vpop.permute.xlu1 %465  ;;  %v4184_v16 = vld [vmem:[%s5774_s2 + $0x284] ss:$20 sps:$4 sm:$0xff]  }
 0x141   :  { %v1031_v19 = vadd.f32 %v3787_v56, %v426_v39  ;;  %v1022_v24 = vpop.f32.mrb[51].mxu0  ;;  %2165 = vmatprep.subr.bf16.mxu1 %v4332_v2  ;;  %2118 = vmatprep.mubr.bf16.mxu1 %v4166_v8  ;;  %v1148_v45 = vmax.f32 %v1028_v13, 0.0 }
 0x142   :  { %v1023_v27 = vadd.f32 %v1022_v24, %v5122_v23  ;;  %v1146_v52 = vmax.f32 %v1020_v17, 0.0  ;;  %v4172_v23 = vld [vmem:[%s5774_s2 + $0x234] ss:$20 sps:$4 sm:$0xff]  }
 0x143   :  { %v1149_v10 = vmax.f32 %v1031_v19, 0.0  ;;  %v471_v31 = vpop.permute.xlu0 %470 }
 0x144   :  { %v1147_v29 = vmax.f32 %v1023_v27, 0.0  ;;  %2166 = vmatpush1.bf16.msra.mxu1 %v1189_v7  ;;  %v476_v54 = vpop.permute.xlu1 %475  ;;  %v4186_v27 = vld [vmem:[%s5774_s2 + $0x118] ss:$20 sps:$4 sm:$0xff]  }
 0x145   :  { %v1191_v22 = vpack.c.bf16 %v1149_v10, %v1148_v45  ;;  %2167 = vmatprep.subr.bf16.mxu1 %v4332_v2 }
 0x146   :  { %v3790_v62 = vpop.f32.mrb[52].mxu0  ;;  %v1190_v32 = vpack.c.bf16 %v1147_v29, %v1146_v52  ;;  %v4188_v29 = vld [vmem:[%s5774_s2 + $0x144] ss:$20 sps:$4 sm:$0xff]  }
 0x147   :  { %v1044_v57 = vadd.f32 %v3790_v62, %v441_v3  ;;  %v1035_v34 = vpop.f32.mrb[53].mxu0  ;;  %2047 = vmatmul.mubr.bf16.gmra.mrb[84].mxu0 %v4168_v38  ;;  %2119 = vmatmul.mubr.bf16.gmra.mrb[16].mxu1 %v4169_v25  ;;  %v481_v53 = vpop.permute.xlu0 %480  ;;  %v4187_v38 = vld [vmem:[%s5774_s2 + $0x280] ss:$20 sps:$4 sm:$0xff]  }
 0x148   :  { %v3791_v39 = vpop.f32.mrb[54].mxu0  ;;  %v1036_v63 = vadd.f32 %v1035_v34, %v5144_v20  ;;  %2168 = vmatpush1.bf16.msra.mxu1 %v1190_v32  ;;  %2054 = vmatprep.mubr.bf16.mxu0 %v4170_v30  ;;  %v4175_v20 = vld [vmem:[%s5774_s2 + $0x230] ss:$20 sps:$4 sm:$0xff]   ;;  %v486_v36 = vpop.permute.xlu1 %485  ;;  %v4192_v62 = vld [vmem:[%s5774_s2 + $0xc] ss:$20 sps:$4 sm:$0xff]  }
 0x149   :  { %v1047_v40 = vadd.f32 %v3791_v39, %v446_v0  ;;  %v1038_v43 = vpop.f32.mrb[55].mxu0  ;;  %2169 = vmatprep.subr.bf16.mxu1 %v4332_v2  ;;  %2126 = vmatprep.mubr.bf16.mxu1 %v4172_v23  ;;  %v1152_v44 = vmax.f32 %v1044_v57, 0.0  ;;  %v4180_v0 = vld [vmem:[%s5774_s2 + $0xf0] ss:$20 sps:$4 sm:$0xff]  }
 0x14a   :  { %v1039_v47 = vadd.f32 %v1038_v43, %v5155_v61  ;;  %v1150_v21 = vmax.f32 %v1036_v63, 0.0  ;;  %v4178_v61 = vld [vmem:[%s5774_s2 + $0x25c] ss:$20 sps:$4 sm:$0xff]  }
 0x14b   :  { %v1153_v46 = vmax.f32 %v1047_v40, 0.0  ;;  %v491_v14 = vpop.permute.xlu0 %490 }
 0x14c   :  { %v1151_v50 = vmax.f32 %v1039_v47, 0.0  ;;  %2170 = vmatpush1.bf16.msra.mxu1 %v1191_v22  ;;  %v496_v19 = vpop.permute.xlu1 %495  ;;  %v4190_v47 = vld [vmem:[%s5774_s2 + $0x8] ss:$20 sps:$4 sm:$0xff]  }
 0x14d   :  { %v1193_v35 = vpack.c.bf16 %v1153_v46, %v1152_v44  ;;  %2171 = vmatprep.subr.bf16.mxu1 %v4332_v2 }
 0x14e   :  { %v3794_v26 = vpop.f32.mrb[56].mxu0  ;;  %v1192_v55 = vpack.c.bf16 %v1151_v50, %v1150_v21  ;;  %v4333_v50 = vmov 0.0  }
 0x14f   :  { %v1060_v58 = vadd.f32 %v3794_v26, %v461_v33  ;;  %v1051_v60 = vpop.f32.mrb[57].mxu0  ;;  %2055 = vmatmul.mubr.bf16.gmra.mrb[88].mxu0 %v4174_v49  ;;  %2127 = vmatmul.mubr.bf16.gmra.mrb[20].mxu1 %v4175_v20  ;;  %v501_v30 = vpop.permute.xlu0 %500  ;;  %v4197_v26 = vld [vmem:[%s5774_s2 + $0x5c] ss:$20 sps:$4 sm:$0xff]  }
 0x150   :  { %v3795_v11 = vpop.f32.mrb[58].mxu0  ;;  %v1052_v1 = vadd.f32 %v1051_v60, %v451_v42  ;;  %2172 = vmatpush1.bf16.msra.mxu1 %v1192_v55  ;;  %2062 = vmatprep.mubr.bf16.mxu0 %v4176_v51  ;;  %v506_v34 = vpop.permute.xlu1 %505  ;;  %v4200_v55 = vld [vmem:[%s5774_s2 + $0x84] ss:$20 sps:$4 sm:$0xff]   ;;  %v4203_v60 = vld [vmem:[%s5774_s2 + $0xac] ss:$20 sps:$4 sm:$0xff]  }
 0x151   :  { %v1063_v18 = vadd.f32 %v3795_v11, %v466_v37  ;;  %v1054_v3 = vpop.f32.mrb[59].mxu0  ;;  %2173 = vmatprep.subr.bf16.mxu1 %v4332_v2  ;;  %2134 = vmatprep.mubr.bf16.mxu1 %v4178_v61  ;;  %v1156_v12 = vmax.f32 %v1060_v58, 0.0  ;;  %v4199_v61 = vld [vmem:[%s5774_s2 + $0x58] ss:$20 sps:$4 sm:$0xff]   ;;  %v4202_v58 = vld [vmem:[%s5774_s2 + $0x80] ss:$20 sps:$4 sm:$0xff]  }
 0x152   :  { %v1055_v59 = vadd.f32 %v1054_v3, %v5180_v28  ;;  %v1154_v15 = vmax.f32 %v1052_v1, 0.0  ;;  %v4205_v11 = vld [vmem:[%s5774_s2 + $0xa8] ss:$20 sps:$4 sm:$0xff]   ;;  %v4211_v3 = vld [vmem:[%s5774_s2 + $0xf8] ss:$20 sps:$4 sm:$0xff]  }
 0x153   :  { %v1157_v4 = vmax.f32 %v1063_v18, 0.0  ;;  %v4206_v1 = vld [vmem:[%s5774_s2 + $0xd4] ss:$20 sps:$4 sm:$0xff]   ;;  %v4208_v18 = vld [vmem:[%s5774_s2 + $0xd0] ss:$20 sps:$4 sm:$0xff]  }
 0x154   :  { %v1155_v7 = vmax.f32 %v1055_v59, 0.0  ;;  %2174 = vmatpush1.bf16.msra.mxu1 %v1193_v35  ;;  %v4194_v35 = vld [vmem:[%s5774_s2 + $0x34] ss:$20 sps:$4 sm:$0xff]   ;;  %v4215_v59 = vld [vmem:[%s5774_s2 + $0x14c] ss:$20 sps:$4 sm:$0xff]  }
 0x155   :  { %v1195_v5 = vpack.c.bf16 %v1157_v4, %v1156_v12  ;;  %2175 = vmatprep.subr.bf16.mxu1 %v4332_v2  ;;  %v4212_v12 = vld [vmem:[%s5774_s2 + $0x124] ss:$20 sps:$4 sm:$0xff]   ;;  %v4214_v4 = vld [vmem:[%s5774_s2 + $0x120] ss:$20 sps:$4 sm:$0xff]  }
 0x156   :  { %v3798_v48 = vpop.f32.mrb[60].mxu0  ;;  %v1194_v8 = vpack.c.bf16 %v1155_v7, %v1154_v15  ;;  %v4221_v15 = vld [vmem:[%s5774_s2 + $0x19c] ss:$20 sps:$4 sm:$0xff]   ;;  %v4224_v7 = vld [vmem:[%s5774_s2 + $0x1c4] ss:$20 sps:$4 sm:$0xff]  }
 0x157   :  { %v1076_v9 = vadd.f32 %v3798_v48, %v481_v53  ;;  %v1067_v13 = vpop.f32.mrb[61].mxu0  ;;  %2063 = vmatmul.mubr.bf16.gmra.mrb[92].mxu0 %v4180_v0  ;;  %2135 = vmatmul.mubr.bf16.gmra.mrb[24].mxu1 %v4181_v6  ;;  %v4209_v53 = vld [vmem:[%s5774_s2 + $0xfc] ss:$20 sps:$4 sm:$0xff]   ;;  %v4218_v0 = vld [vmem:[%s5774_s2 + $0x174] ss:$20 sps:$4 sm:$0xff]  }
 0x158   :  { %v3799_v42 = vpop.f32.mrb[62].mxu0  ;;  %v1068_v56 = vadd.f32 %v1067_v13, %v471_v31  ;;  %2176 = vmatpush1.bf16.msra.mxu1 %v1194_v8  ;;  %2070 = vmatprep.mubr.bf16.mxu0 %v4182_v41  ;;  %v4193_v31 = vld [vmem:[%s5774_s2 + $0x140] ss:$20 sps:$4 sm:$0xff]   ;;  %v4220_v6 = vld [vmem:[%s5774_s2 + $0x170] ss:$20 sps:$4 sm:$0xff]  }
 0x159   :  { %v1079_v17 = vadd.f32 %v3799_v42, %v486_v36  ;;  %v1070_v28 = vpop.f32.mrb[63].mxu0  ;;  %2177 = vmatprep.subr.bf16.mxu1 %v4332_v2  ;;  %2142 = vmatprep.mubr.bf16.mxu1 %v4184_v16  ;;  %v1160_v24 = vmax.f32 %v1076_v9, 0.0  ;;  %v4217_v36 = vld [vmem:[%s5774_s2 + $0x148] ss:$20 sps:$4 sm:$0xff]   ;;  %v4226_v41 = vld [vmem:[%s5774_s2 + $0x1c0] ss:$20 sps:$4 sm:$0xff]  }
 0x15a   :  { %v1071_v10 = vadd.f32 %v1070_v28, %v476_v54  ;;  %v1158_v25 = vmax.f32 %v1068_v56, 0.0  ;;  %v4196_v54 = vld [vmem:[%s5774_s2 + $0x30] ss:$20 sps:$4 sm:$0xff]   ;;  %v4227_v48 = vld [vmem:[%s5774_s2 + $0x1ec] ss:$20 sps:$4 sm:$0xff]  }
 0x15b   :  { %v1161_v45 = vmax.f32 %v1079_v17, 0.0  ;;  %v4229_v16 = vld [vmem:[%s5774_s2 + $0x1e8] ss:$20 sps:$4 sm:$0xff]   ;;  %v4232_v9 = vld [vmem:[%s5774_s2 + $0x210] ss:$20 sps:$4 sm:$0xff]  }
 0x15c   :  { %v1159_v22 = vmax.f32 %v1071_v10, 0.0  ;;  %2178 = vmatpush1.bf16.msra.mxu1 %v1195_v5  ;;  %v4223_v5 = vld [vmem:[%s5774_s2 + $0x198] ss:$20 sps:$4 sm:$0xff]   ;;  %v4230_v8 = vld [vmem:[%s5774_s2 + $0x214] ss:$20 sps:$4 sm:$0xff]  }
 0x15d   :  { %v1197_v52 = vpack.c.bf16 %v1161_v45, %v1160_v24  ;;  %2179 = vmatprep.subr.bf16.mxu1 %v4332_v2  ;;  %v4233_v13 = vld [vmem:[%s5774_s2 + $0x23c] ss:$20 sps:$4 sm:$0xff]   ;;  %v4236_v42 = vld [vmem:[%s5774_s2 + $0x264] ss:$20 sps:$4 sm:$0xff]   ;;  %v4238_v56 = vld [vmem:[%s5774_s2 + $0x260] ss:$20 sps:$4 sm:$0xff]  }
 0x15e   :  { %v3802_v33 = vpop.f32.mrb[64].mxu0  ;;  %v1196_v23 = vpack.c.bf16 %v1159_v22, %v1158_v25  ;;  %v4239_v17 = vld [vmem:[%s5774_s2 + $0x28c] ss:$20 sps:$4 sm:$0xff]   ;;  %v4242_v28 = vld [vmem:[%s5774_s2 + $0x10] ss:$20 sps:$4 sm:$0xff]  }
 0x15f   :  { %v1092_v32 = vadd.f32 %v3802_v33, %v501_v30  ;;  %v1083_v57 = vpop.f32.mrb[65].mxu0  ;;  %2071 = vmatmul.mubr.bf16.gmra.mrb[96].mxu0 %v4186_v27  ;;  %2143 = vmatmul.mubr.bf16.gmra.mrb[28].mxu1 %v4187_v38  ;;  %v4243_v24 = vld [vmem:[%s5774_s2 + $0x38] ss:$20 sps:$4 sm:$0xff]   ;;  %v4244_v27 = vld [vmem:[%s5774_s2 + $0x60] ss:$20 sps:$4 sm:$0xff]  }
 0x160   :  { %v3803_v37 = vpop.f32.mrb[66].mxu0  ;;  %v1084_v39 = vadd.f32 %v1083_v57, %v491_v14  ;;  %2180 = vmatpush1.bf16.msra.mxu1 %v1196_v23  ;;  %2078 = vmatprep.mubr.bf16.mxu0 %v4188_v29  ;;  %v4235_v14 = vld [vmem:[%s5774_s2 + $0x238] ss:$20 sps:$4 sm:$0xff]   ;;  %v4245_v29 = vld [vmem:[%s5774_s2 + $0x88] ss:$20 sps:$4 sm:$0xff]  }
 0x161   :  { %v1095_v63 = vadd.f32 %v3803_v37, %v506_v34  ;;  %v1086_v40 = vpop.f32.mrb[67].mxu0  ;;  %2181 = vmatprep.subr.bf16.mxu1 %v4332_v2  ;;  %2183 = vmatprep.mubr.bf16.mxu1 %v4192_v62  ;;  %v1164_v43 = vmax.f32 %v1092_v32, 0.0  ;;  %v4246_v32 = vld [vmem:[%s5774_s2 + $0xb0] ss:$20 sps:$4 sm:$0xff]  }
 0x162   :  { %v1087_v46 = vadd.f32 %v1086_v40, %v496_v19  ;;  %v1162_v49 = vmax.f32 %v1084_v39, 0.0  ;;  %v4241_v19 = vld [vmem:[%s5774_s2 + $0x288] ss:$20 sps:$4 sm:$0xff]  }
 0x163   :  { %v1165_v44 = vmax.f32 %v1095_v63, 0.0  ;;  %v4247_v63 = vld [vmem:[%s5774_s2 + $0xd8] ss:$20 sps:$4 sm:$0xff]  }
 0x164   :  { %v1163_v21 = vmax.f32 %v1087_v46, 0.0  ;;  %2182 = vmatpush1.bf16.msra.mxu1 %v1197_v52 }
 0x165   :  { %v1199_v20 = vpack.c.bf16 %v1165_v44, %v1164_v43  ;;  %3804 = vmatprep.subr.bf16.mxu1 %v4333_v50 }
 0x166   :  { %v1198_v51 = vpack.c.bf16 %v1163_v21, %v1162_v49 }
 0x167   :  { %2079 = vmatmul.mubr.bf16.gmra.mrb[100].mxu0 %v4193_v31  ;;  %2184 = vmatmul.mubr.bf16.vlgmr.msra.gmra.mrb[32].mxu1 %v4190_v47  ;;  %v4248_v47 = vld [vmem:[%s5774_s2 + $0x100] ss:$20 sps:$4 sm:$0xff]  }
 0x168   :  { %3805 = vmatpush3.bf16.msra.mxu1 %v1198_v51  ;;  %2191 = vmatprep.mubr.bf16.mxu1 %v4194_v35  ;;  %v4249_v35 = vld [vmem:[%s5774_s2 + $0x128] ss:$20 sps:$4 sm:$0xff]  }
 0x169   :  { %3806 = vmatprep.subr.bf16.mxu1 %v4333_v50 }
 0x16c   :  { %3807 = vmatpush3.bf16.msra.mxu1 %v1199_v20 }
 0x16f   :  { %2192 = vmatmul.mubr.bf16.gmra.mrb[36].mxu1 %v4196_v54 }
 0x170   :  { %2199 = vmatprep.mubr.bf16.mxu1 %v4197_v26 }
 0x177   :  { %2200 = vmatmul.mubr.bf16.gmra.mrb[40].mxu1 %v4199_v61 }
 0x178   :  { %2207 = vmatprep.mubr.bf16.mxu1 %v4200_v55  ;;  %v4250_v55 = vld [vmem:[%s5774_s2 + $0x150] ss:$20 sps:$4 sm:$0xff]  }
 0x17f   :  { %2208 = vmatmul.mubr.bf16.gmra.mrb[44].mxu1 %v4202_v58 }
 0x180   :  { %2215 = vmatprep.mubr.bf16.mxu1 %v4203_v60 }
 0x187   :  { %2216 = vmatmul.mubr.bf16.gmra.mrb[48].mxu1 %v4205_v11 }
 0x188   :  { %2223 = vmatprep.mubr.bf16.mxu1 %v4206_v1 }
 0x18f   :  { %2224 = vmatmul.mubr.bf16.gmra.mrb[52].mxu1 %v4208_v18  ;;  %v4251_v18 = vld [vmem:[%s5774_s2 + $0x178] ss:$20 sps:$4 sm:$0xff]  }
 0x190   :  { %2231 = vmatprep.mubr.bf16.mxu1 %v4209_v53 }
 0x197   :  { %2232 = vmatmul.mubr.bf16.gmra.mrb[56].mxu1 %v4211_v3 }
 0x198   :  { %2239 = vmatprep.mubr.bf16.mxu1 %v4212_v12 }
 0x19f   :  { %2240 = vmatmul.mubr.bf16.gmra.mrb[60].mxu1 %v4214_v4 }
 0x1a0   :  { %2247 = vmatprep.mubr.bf16.mxu1 %v4215_v59  ;;  %v4252_v59 = vld [vmem:[%s5774_s2 + $0x1a0] ss:$20 sps:$4 sm:$0xff]  }
 0x1a7   :  { %2248 = vmatmul.mubr.bf16.gmra.mrb[64].mxu1 %v4217_v36 }
 0x1a8   :  { %2255 = vmatprep.mubr.bf16.mxu1 %v4218_v0 }
 0x1af   :  { %2256 = vmatmul.mubr.bf16.gmra.mrb[0].mxu1 %v4220_v6  ;;  %v4253_v6 = vld [vmem:[%s5774_s2 + $0x1c8] ss:$20 sps:$4 sm:$0xff]  }
 0x1b0   :  { %2263 = vmatprep.mubr.bf16.mxu1 %v4221_v15  ;;  %v4254_v15 = vld [vmem:[%s5774_s2 + $0x1f0] ss:$20 sps:$4 sm:$0xff]  }
 0x1b7   :  { %2264 = vmatmul.mubr.bf16.gmra.mrb[4].mxu1 %v4223_v5  ;;  %v4255_v5 = vld [vmem:[%s5774_s2 + $0x218] ss:$20 sps:$4 sm:$0xff]  }
 0x1b8   :  { %2271 = vmatprep.mubr.bf16.mxu1 %v4224_v7  ;;  %v4256_v7 = vld [vmem:[%s5774_s2 + $0x240] ss:$20 sps:$4 sm:$0xff]  }
 0x1bf   :  { %2272 = vmatmul.mubr.bf16.gmra.mrb[8].mxu1 %v4226_v41  ;;  %v4257_v41 = vld [vmem:[%s5774_s2 + $0x268] ss:$20 sps:$4 sm:$0xff]  }
 0x1c0   :  { %2279 = vmatprep.mubr.bf16.mxu1 %v4227_v48  ;;  %v4258_v48 = vld [vmem:[%s5774_s2 + $0x290] ss:$20 sps:$4 sm:$0xff]  }
 0x1c7   :  { %2280 = vmatmul.mubr.bf16.gmra.mrb[12].mxu1 %v4229_v16  ;;  %v5485_v16 = vpop.permute.xlu0 %1418 }
 0x1c8   :  { %2287 = vmatprep.mubr.bf16.mxu1 %v4230_v8  ;;  %v5487_v8 = vpop.permute.xlu1 %1423 }
 0x1cf   :  { %2288 = vmatmul.mubr.bf16.gmra.mrb[16].mxu1 %v4232_v9  ;;  %v1339_v9 = vpop.permute.xlu0 %1338 }
 0x1d0   :  { %2295 = vmatprep.mubr.bf16.mxu1 %v4233_v13  ;;  %v1344_v13 = vpop.permute.xlu1 %1343 }
 0x1d7   :  { %2296 = vmatmul.mubr.bf16.gmra.mrb[20].mxu1 %v4235_v14  ;;  %v1349_v14 = vpop.permute.xlu0 %1348 }
 0x1d8   :  { %2303 = vmatprep.mubr.bf16.mxu1 %v4236_v42  ;;  %v1354_v42 = vpop.permute.xlu1 %1353 }
 0x1df   :  { %2304 = vmatmul.mubr.bf16.gmra.mrb[24].mxu1 %v4238_v56  ;;  %v5489_v56 = vpop.permute.xlu0 %1428 }
 0x1e0   :  { %2311 = vmatprep.mubr.bf16.mxu1 %v4239_v17  ;;  %v5491_v17 = vpop.permute.xlu1 %1433 }
 0x1e7   :  { %2312 = vmatmul.mubr.bf16.gmra.mrb[28].mxu1 %v4241_v19  ;;  %v1359_v19 = vpop.permute.xlu0 %1358 }
 0x1e8   :  { %3808 = vmatprep.mubr.msk.bf16.mxu1 %vm4334_vm1, %v4333_v50 }
 0x1ef   :  { %3809 = vmatmul.mubr.msk.bf16.vlgmr.msra.gmra.mrb[32].mxu1 %vm690_vm0, %v4242_v28  ;;  %v1364_v28 = vpop.permute.xlu1 %1363 }
 0x1f0   :  { %3812 = vmatprep.mubr.msk.bf16.mxu1 %vm4334_vm1, %v4333_v50 }
 0x1f7   :  { %3813 = vmatmul.mubr.msk.bf16.gmra.mrb[36].mxu1 %vm690_vm0, %v4243_v24 }
 0x1f8   :  { %3816 = vmatprep.mubr.msk.bf16.mxu1 %vm4334_vm1, %v4333_v50 }
 0x1fa   :  { %v5361_v45 = vpop.f32.mrb[68].mxu0 }
 0x1fb   :  { %v2018_v10 = vpop.f32.mrb[69].mxu0  ;;  %v2017_v24 = vadd.f32 %v5361_v45, %v1339_v9 }
 0x1fc   :  { %v5366_v38 = vpop.f32.mrb[70].mxu0  ;;  %v5494_v10 = vpop.permute.xlu0 %1438 }
 0x1fd   :  { %v2021_v25 = vpop.f32.mrb[71].mxu0 }
 0x1fe   :  { %v2020_v25 = vadd.f32 %v5366_v38, %v1344_v13 }
 0x1ff   :  { %3817 = vmatmul.mubr.msk.bf16.gmra.mrb[40].mxu1 %vm690_vm0, %v4244_v27 }
 0x200   :  { %3820 = vmatprep.mubr.msk.bf16.mxu1 %vm4334_vm1, %v4333_v50  ;;  %v1369_v45 = vpop.permute.xlu0 %1368 }
 0x202   :  { %v5371_v52 = vpop.f32.mrb[72].mxu0 }
 0x203   :  { %v2026_v22 = vpop.f32.mrb[73].mxu0 }
 0x204   :  { %v5376_v30 = vpop.f32.mrb[74].mxu0 }
 0x205   :  { %v2029_v33 = vpop.f32.mrb[75].mxu0 }
 0x206   :  { %v5497_v33 = vpop.permute.xlu1 %1443 }
 0x207   :  { %3821 = vmatmul.mubr.msk.bf16.gmra.mrb[44].mxu1 %vm690_vm0, %v4245_v29 }
 0x208   :  { %3824 = vmatprep.mubr.msk.bf16.mxu1 %vm4334_vm1, %v4333_v50 }
 0x20a   :  { %v5381_v62 = vpop.f32.mrb[76].mxu0  ;;  %v1374_v38 = vpop.permute.xlu1 %1373 }
 0x20b   :  { %v2034_v23 = vpop.f32.mrb[77].mxu0 }
 0x20c   :  { %v5386_v57 = vpop.f32.mrb[78].mxu0 }
 0x20d   :  { %v2037_v34 = vpop.f32.mrb[79].mxu0 }
 0x20f   :  { %3825 = vmatmul.mubr.msk.bf16.gmra.mrb[48].mxu1 %vm690_vm0, %v4246_v32  ;;  %v4261_v32 = vld [vmem:[%s5775_s3 + $0x4] ss:$12 sps:$4 sm:$0xff]  }
 0x210   :  { %3828 = vmatprep.mubr.msk.bf16.mxu1 %vm4334_vm1, %v4333_v50  ;;  %2866 = vmatprep.mubr.bf16.mxu0 %v4261_v32 }
 0x212   :  { %v5391_v37 = vpop.f32.mrb[80].mxu0 }
 0x213   :  { %v2042_v39 = vpop.f32.mrb[81].mxu0 }
 0x214   :  { %v5396_v40 = vpop.f32.mrb[82].mxu0 }
 0x215   :  { %v2045_v43 = vpop.f32.mrb[83].mxu0 }
 0x217   :  { %3829 = vmatmul.mubr.msk.bf16.gmra.mrb[52].mxu1 %vm690_vm0, %v4247_v63 }
 0x218   :  { %3832 = vmatprep.mubr.msk.bf16.mxu1 %vm4334_vm1, %v4333_v50 }
 0x21a   :  { %v5401_v44 = vpop.f32.mrb[84].mxu0 }
 0x21b   :  { %v2050_v46 = vpop.f32.mrb[85].mxu0 }
 0x21c   :  { %v5406_v31 = vpop.f32.mrb[86].mxu0  ;;  %v2025_v46 = vadd.f32 %v5371_v52, %v1349_v14 }
 0x21d   :  { %v2053_v49 = vpop.f32.mrb[87].mxu0 }
 0x21f   :  { %3833 = vmatmul.mubr.msk.bf16.gmra.mrb[56].mxu1 %vm690_vm0, %v4248_v47 }
 0x220   :  { %3836 = vmatprep.mubr.msk.bf16.mxu1 %vm4334_vm1, %v4333_v50 }
 0x222   :  { %v5411_v20 = vpop.f32.mrb[88].mxu0 }
 0x223   :  { %v2058_v21 = vpop.f32.mrb[89].mxu0 }
 0x224   :  { %v5416_v51 = vpop.f32.mrb[90].mxu0  ;;  %v2028_v21 = vadd.f32 %v5376_v30, %v1354_v42  ;;  %v2041_v42 = vadd.f32 %v5391_v37, %v1369_v45 }
 0x225   :  { %v2061_v54 = vpop.f32.mrb[91].mxu0 }
 0x227   :  { %3837 = vmatmul.mubr.msk.bf16.gmra.mrb[60].mxu1 %vm690_vm0, %v4249_v35 }
 0x228   :  { %3840 = vmatprep.mubr.msk.bf16.mxu1 %vm4334_vm1, %v4333_v50 }
 0x22a   :  { %v5421_v26 = vpop.f32.mrb[92].mxu0 }
 0x22b   :  { %v2066_v61 = vpop.f32.mrb[93].mxu0 }
 0x22c   :  { %v5426_v58 = vpop.f32.mrb[94].mxu0 }
 0x22d   :  { %v2069_v60 = vpop.f32.mrb[95].mxu0 }
 0x22f   :  { %3841 = vmatmul.mubr.msk.bf16.gmra.mrb[64].mxu1 %vm690_vm0, %v4250_v55 }
 0x230   :  { %3844 = vmatprep.mubr.msk.bf16.mxu1 %vm4334_vm1, %v4333_v50 }
 0x232   :  { %v5431_v11 = vpop.f32.mrb[96].mxu0 }
 0x233   :  { %v2074_v1 = vpop.f32.mrb[97].mxu0 }
 0x234   :  { %v5436_v53 = vpop.f32.mrb[98].mxu0  ;;  %v5506_v1 = vpop.permute.xlu0 %1448 }
 0x235   :  { %v2077_v3 = vpop.f32.mrb[99].mxu0 }
 0x237   :  { %3845 = vmatmul.mubr.msk.bf16.gmra.mrb[0].mxu1 %vm690_vm0, %v4251_v18 }
 0x238   :  { %3848 = vmatprep.mubr.msk.bf16.mxu1 %vm4334_vm1, %v4333_v50 }
 0x23a   :  { %v5441_v12 = vpop.f32.mrb[100].mxu0 }
 0x23b   :  { %v2082_v4 = vpop.f32.mrb[101].mxu0 }
 0x23c   :  { %v5446_v36 = vpop.f32.mrb[102].mxu0  ;;  %v5508_v4 = vpop.permute.xlu1 %1453 }
 0x23d   :  { %v2085_v0 = vpop.f32.mrb[103].mxu0 }
 0x23f   :  { %3849 = vmatmul.mubr.msk.bf16.gmra.mrb[4].mxu1 %vm690_vm0, %v4252_v59  ;;  %v2033_v59 = vadd.f32 %v5381_v62, %v1359_v19  ;;  %v2044_v19 = vadd.f32 %v5396_v40, %v1374_v38 }
 0x240   :  { %3852 = vmatprep.mubr.msk.bf16.mxu1 %vm4334_vm1, %v4333_v50  ;;  %v1384_v9 = vpop.permute.xlu1 %1383 }
 0x247   :  { %3853 = vmatmul.mubr.msk.bf16.gmra.mrb[8].mxu1 %vm690_vm0, %v4253_v6  ;;  %v2036_v6 = vadd.f32 %v5386_v57, %v1364_v28  ;;  %v5520_v28 = vpop.permute.xlu1 %1463 }
 0x248   :  { %3856 = vmatprep.mubr.msk.bf16.mxu1 %vm4334_vm1, %v4333_v50 }
 0x24f   :  { %3857 = vmatmul.mubr.msk.bf16.gmra.mrb[12].mxu1 %vm690_vm0, %v4254_v15 }
 0x250   :  { %3860 = vmatprep.mubr.msk.bf16.mxu1 %vm4334_vm1, %v4333_v50 }
 0x257   :  { %3861 = vmatmul.mubr.msk.bf16.gmra.mrb[16].mxu1 %vm690_vm0, %v4255_v5  ;;  %v1379_v5 = vpop.permute.xlu0 %1378 }
 0x258   :  { %3864 = vmatprep.mubr.msk.bf16.mxu1 %vm4334_vm1, %v4333_v50 }
 0x25f   :  { %3865 = vmatmul.mubr.msk.bf16.gmra.mrb[20].mxu1 %vm690_vm0, %v4256_v7 }
 0x260   :  { %3868 = vmatprep.mubr.msk.bf16.mxu1 %vm4334_vm1, %v4333_v50 }
 0x267   :  { %3869 = vmatmul.mubr.msk.bf16.gmra.mrb[24].mxu1 %vm690_vm0, %v4257_v41 }
 0x268   :  { %3872 = vmatprep.mubr.msk.bf16.mxu1 %vm4334_vm1, %v4333_v50 }
 0x26f   :  { %3873 = vmatmul.mubr.msk.bf16.gmra.mrb[28].mxu1 %vm690_vm0, %v4258_v48 }
 0x2c2   :  { %v2354_v27 = vpop.f32.mrb[32].mxu1 }
 0x2c3   :  { %v3947_v22 = vadd.f32 %v2354_v27, %v2017_v24  ;;  %v3810_v29 = vpop.f32.mrb[33].mxu1  ;;  %v5517_v27 = vpop.permute.xlu0 %1458 }
 0x2c4   :  { %v2357_v23 = vpop.f32.mrb[34].mxu1 }
 0x2c5   :  { %v3949_v34 = vadd.f32 %v2357_v23, %v2020_v25  ;;  %v3811_v39 = vpop.f32.mrb[35].mxu1  ;;  %v2489_v63 = vmax.f32 %v3947_v22, 0.0 }
 0x2c7   :  { %v2490_v43 = vmax.f32 %v3949_v34, 0.0  ;;  %v1389_v39 = vpop.permute.xlu0 %1388 }
 0x2c9   :  { %v5503_v47 = vpack.c.bf16 %v2490_v43, %v2489_v63  ;;  %v2049_v63 = vadd.f32 %v5401_v44, %v1379_v5  ;;  %v1394_v43 = vpop.permute.xlu1 %1393 }
 0x2ca   :  { %v2362_v49 = vpop.f32.mrb[36].mxu1 }
 0x2cb   :  { %v3951_v35 = vadd.f32 %v2362_v49, %v2025_v46  ;;  %v3814_v54 = vpop.f32.mrb[37].mxu1  ;;  %v2052_v46 = vadd.f32 %v5406_v31, %v1384_v9 }
 0x2cc   :  { %v2365_v61 = vpop.f32.mrb[38].mxu1  ;;  %v5526_v54 = vpop.permute.xlu0 %1468 }
 0x2cd   :  { %v3953_v55 = vadd.f32 %v2365_v61, %v2028_v21  ;;  %v3815_v60 = vpop.f32.mrb[39].mxu1  ;;  %v2491_v18 = vmax.f32 %v3951_v35, 0.0 }
 0x2ce   :  { %v5528_v60 = vpop.permute.xlu1 %1473 }
 0x2cf   :  { %v2492_v3 = vmax.f32 %v3953_v55, 0.0 }
 0x2d1   :  { %v5511_v52 = vpack.c.bf16 %v2492_v3, %v2491_v18  ;;  %v2057_v18 = vadd.f32 %v5411_v20, %v1389_v39 }
 0x2d2   :  { %v2370_v0 = vpop.f32.mrb[40].mxu1 }
 0x2d3   :  { %v3955_v15 = vadd.f32 %v2370_v0, %v2033_v59  ;;  %v3818_v30 = vpop.f32.mrb[41].mxu1  ;;  %v2060_v59 = vadd.f32 %v5416_v51, %v1394_v43 }
 0x2d4   :  { %v2373_v7 = vpop.f32.mrb[42].mxu1 }
 0x2d5   :  { %v3957_v41 = vadd.f32 %v2373_v7, %v2036_v6  ;;  %v3819_v48 = vpop.f32.mrb[43].mxu1  ;;  %v2493_v13 = vmax.f32 %v3955_v15, 0.0  ;;  %v1399_v6 = vpop.permute.xlu0 %1398 }
 0x2d6   :  { %v1404_v7 = vpop.permute.xlu1 %1403  ;;  %v2065_v9 = vadd.f32 %v5421_v26, %v1399_v6 }
 0x2d7   :  { %v2494_v14 = vmax.f32 %v3957_v41, 0.0 }
 0x2d9   :  { %v5515_v24 = vpack.c.bf16 %v2494_v14, %v2493_v13  ;;  %v5537_v14 = vpop.permute.xlu0 %1478 }
 0x2da   :  { %v2378_v62 = vpop.f32.mrb[44].mxu1 }
 0x2db   :  { %v3959_v25 = vadd.f32 %v2378_v62, %v2041_v42  ;;  %v3822_v57 = vpop.f32.mrb[45].mxu1  ;;  %v2068_v42 = vadd.f32 %v5426_v58, %v1404_v7 }
 0x2dc   :  { %v2381_v22 = vpop.f32.mrb[46].mxu1 }
 0x2dd   :  { %v3961_v29 = vadd.f32 %v2381_v22, %v2044_v19  ;;  %v3823_v23 = vpop.f32.mrb[47].mxu1  ;;  %v2495_v32 = vmax.f32 %v3959_v25, 0.0  ;;  %v5540_v19 = vpop.permute.xlu1 %1483 }
 0x2df   :  { %v2496_v34 = vmax.f32 %v3961_v29, 0.0 }
 0x2e1   :  { %v5523_v37 = vpack.c.bf16 %v2496_v34, %v2495_v32  ;;  %v1409_v32 = vpop.permute.xlu0 %1408  ;;  %v1414_v39 = vpop.permute.xlu1 %1413 }
 0x2e2   :  { %v2386_v45 = vpop.f32.mrb[48].mxu1  ;;  %v2073_v34 = vadd.f32 %v5431_v11, %v1409_v32  ;;  %v2076_v43 = vadd.f32 %v5436_v53, %v1414_v39  ;;  %v2084_v11 = vadd.f32 %v5446_v36, %v5487_v8 }
 0x2e3   :  { %v3963_v49 = vadd.f32 %v2386_v45, %v2049_v63  ;;  %v3826_v40 = vpop.f32.mrb[49].mxu1 }
 0x2e4   :  { %v2389_v38 = vpop.f32.mrb[50].mxu1 }
 0x2e5   :  { %v3965_v21 = vadd.f32 %v2389_v38, %v2052_v46  ;;  %v3827_v35 = vpop.f32.mrb[51].mxu1  ;;  %v2497_v61 = vmax.f32 %v3963_v49, 0.0 }
 0x2e6   :  { %v2081_v35 = vadd.f32 %v5441_v12, %v5485_v16 }
 0x2e7   :  { %v2498_v55 = vmax.f32 %v3965_v21, 0.0 }
 0x2e9   :  { %v5531_v44 = vpack.c.bf16 %v2498_v55, %v2497_v61 }
 0x2ea   :  { %v2394_v3 = vpop.f32.mrb[52].mxu1 }
 0x2eb   :  { %v3967_v0 = vadd.f32 %v2394_v3, %v2057_v18  ;;  %v3830_v31 = vpop.f32.mrb[53].mxu1 }
 0x2ec   :  { %v2397_v15 = vpop.f32.mrb[54].mxu1 }
 0x2ed   :  { %v3969_v30 = vadd.f32 %v2397_v15, %v2060_v59  ;;  %v3831_v5 = vpop.f32.mrb[55].mxu1  ;;  %v2499_v41 = vmax.f32 %v3967_v0, 0.0 }
 0x2ef   :  { %v2500_v48 = vmax.f32 %v3969_v30, 0.0 }
 0x2f1   :  { %v5535_v13 = vpack.c.bf16 %v2500_v48, %v2499_v41 }
 0x2f2   :  { %v2402_v20 = vpop.f32.mrb[56].mxu1 }
 0x2f3   :  { %v3971_v62 = vadd.f32 %v2402_v20, %v2065_v9  ;;  %v3834_v51 = vpop.f32.mrb[57].mxu1 }
 0x2f4   :  { %v2405_v25 = vpop.f32.mrb[58].mxu1 }
 0x2f5   :  { %v3973_v57 = vadd.f32 %v2405_v25, %v2068_v42  ;;  %v3835_v22 = vpop.f32.mrb[59].mxu1  ;;  %v2501_v29 = vmax.f32 %v3971_v62, 0.0 }
 0x2f7   :  { %v2502_v23 = vmax.f32 %v3973_v57, 0.0 }
 0x2f9   :  { %v5543_v26 = vpack.c.bf16 %v2502_v23, %v2501_v29 }
 0x2fa   :  { %v2410_v63 = vpop.f32.mrb[60].mxu1 }
 0x2fb   :  { %v3975_v45 = vadd.f32 %v2410_v63, %v2073_v34  ;;  %v3838_v58 = vpop.f32.mrb[61].mxu1 }
 0x2fc   :  { %v2413_v46 = vpop.f32.mrb[62].mxu1 }
 0x2fd   :  { %v3977_v49 = vadd.f32 %v2413_v46, %v2076_v43  ;;  %v3839_v40 = vpop.f32.mrb[63].mxu1  ;;  %v2503_v38 = vmax.f32 %v3975_v45, 0.0 }
 0x2ff   :  { %v2504_v21 = vmax.f32 %v3977_v49, 0.0 }
 0x301   :  { %v5548_v61 = vpack.c.bf16 %v2504_v21, %v2503_v38 }
 0x302   :  { %v2418_v55 = vpop.f32.mrb[64].mxu1 }
 0x303   :  { %v3979_v18 = vadd.f32 %v2418_v55, %v2081_v35  ;;  %v3842_v3 = vpop.f32.mrb[65].mxu1 }
 0x304   :  { %v2421_v59 = vpop.f32.mrb[66].mxu1 }
 0x305   :  { %v3981_v53 = vadd.f32 %v2421_v59, %v2084_v11  ;;  %v3843_v0 = vpop.f32.mrb[67].mxu1  ;;  %v2505_v31 = vmax.f32 %v3979_v18, 0.0 }
 0x307   :  { %v2506_v6 = vmax.f32 %v3981_v53, 0.0 }
 0x309   :  { %v2531_v15 = vpack.c.bf16 %v2506_v6, %v2505_v31  ;;  %v1489_v6 = vpop.permute.xlu0 %1488 }
 0x30a   :  { %v2426_v30 = vpop.f32.mrb[0].mxu1 }
 0x30b   :  { %v3982_v5 = vadd.f32 %v2426_v30, %v5489_v56  ;;  %v3846_v7 = vpop.f32.mrb[1].mxu1  ;;  %3652 = vmatprep.subr.bf16.mxu0 %v2531_v15 }
 0x30c   :  { %v2429_v12 = vpop.f32.mrb[2].mxu1  ;;  %3653 = vmatpush3.bf16.msra.mxu0 %v5503_v47 }
 0x30d   :  { %v3983_v16 = vadd.f32 %v2429_v12, %v5491_v17  ;;  %v3847_v41 = vpop.f32.mrb[3].mxu1  ;;  %v2507_v36 = vmax.f32 %v3982_v5, 0.0  ;;  %v1494_v5 = vpop.permute.xlu1 %1493 }
 0x30f   :  { %v2508_v8 = vmax.f32 %v3983_v16, 0.0 }
 0x311   :  { %v2532_v48 = vpack.c.bf16 %v2508_v8, %v2507_v36  ;;  %v1499_v36 = vpop.permute.xlu0 %1498 }
 0x312   :  { %v2434_v9 = vpop.f32.mrb[4].mxu1 }
 0x313   :  { %v3984_v20 = vadd.f32 %v2434_v9, %v5494_v10  ;;  %v3850_v42 = vpop.f32.mrb[5].mxu1  ;;  %3654 = vmatprep.subr.bf16.mxu0 %v2532_v48  ;;  %v4259_v9 = vld [vmem:[%s5775_s3] ss:$12 sps:$4 sm:$0xff]  }
 0x314   :  { %v2437_v62 = vpop.f32.mrb[6].mxu1  ;;  %3655 = vmatpush3.bf16.msra.mxu0 %v5511_v52 }
 0x315   :  { %v3985_v56 = vadd.f32 %v2437_v62, %v5497_v33  ;;  %v3851_v51 = vpop.f32.mrb[7].mxu1  ;;  %v2509_v25 = vmax.f32 %v3984_v20, 0.0  ;;  %v1504_v20 = vpop.permute.xlu1 %1503 }
 0x317   :  { %v2510_v57 = vmax.f32 %v3985_v56, 0.0 }
 0x319   :  { %v2533_v47 = vpack.c.bf16 %v2510_v57, %v2509_v25 }
 0x31a   :  { %v2442_v22 = vpop.f32.mrb[8].mxu1 }
 0x31b   :  { %v3986_v17 = vadd.f32 %v2442_v22, %v5506_v1  ;;  %v3854_v29 = vpop.f32.mrb[9].mxu1  ;;  %3656 = vmatprep.subr.bf16.mxu0 %v2533_v47  ;;  %v4264_v47 = vld [vmem:[%s5775_s3 + $0x18] ss:$12 sps:$4 sm:$0xff]   ;;  %v4267_v22 = vld [vmem:[%s5775_s3 + $0x30] ss:$12 sps:$4 sm:$0xff]  }
 0x31c   :  { %v2445_v23 = vpop.f32.mrb[10].mxu1  ;;  %3657 = vmatpush3.bf16.msra.mxu0 %v5515_v24  ;;  %v4270_v29 = vld [vmem:[%s5775_s3 + $0x48] ss:$12 sps:$4 sm:$0xff]  }
 0x31d   :  { %v3987_v10 = vadd.f32 %v2445_v23, %v5508_v4  ;;  %v3855_v32 = vpop.f32.mrb[11].mxu1  ;;  %v2511_v34 = vmax.f32 %v3986_v17, 0.0  ;;  %v4268_v17 = vld [vmem:[%s5775_s3 + $0x4c] ss:$12 sps:$4 sm:$0xff]   ;;  %v4271_v23 = vld [vmem:[%s5775_s3 + $0x64] ss:$12 sps:$4 sm:$0xff]  }
 0x31e   :  { %v4274_v32 = vld [vmem:[%s5775_s3 + $0x7c] ss:$12 sps:$4 sm:$0xff]  }
 0x31f   :  { %v2512_v39 = vmax.f32 %v3987_v10, 0.0  ;;  %v4273_v10 = vld [vmem:[%s5775_s3 + $0x60] ss:$12 sps:$4 sm:$0xff]  }
 0x321   :  { %v2534_v52 = vpack.c.bf16 %v2512_v39, %v2511_v34  ;;  %v4276_v34 = vld [vmem:[%s5775_s3 + $0x78] ss:$12 sps:$4 sm:$0xff]   ;;  %v4277_v39 = vld [vmem:[%s5775_s3 + $0x94] ss:$12 sps:$4 sm:$0xff]  }
 0x322   :  { %v2450_v63 = vpop.f32.mrb[12].mxu1 }
 0x323   :  { %v3988_v33 = vadd.f32 %v2450_v63, %v5517_v27  ;;  %v3858_v43 = vpop.f32.mrb[13].mxu1  ;;  %3658 = vmatprep.subr.bf16.mxu0 %v2534_v52  ;;  %v4279_v52 = vld [vmem:[%s5775_s3 + $0x90] ss:$12 sps:$4 sm:$0xff]   ;;  %v4280_v63 = vld [vmem:[%s5775_s3 + $0xac] ss:$12 sps:$4 sm:$0xff]  }
 0x324   :  { %v2453_v45 = vpop.f32.mrb[14].mxu1  ;;  %3659 = vmatpush3.bf16.msra.mxu0 %v5523_v37  ;;  %v4282_v43 = vld [vmem:[%s5775_s3 + $0xa8] ss:$12 sps:$4 sm:$0xff]  }
 0x325   :  { %v3989_v1 = vadd.f32 %v2453_v45, %v5520_v28  ;;  %v3859_v58 = vpop.f32.mrb[15].mxu1  ;;  %v2513_v46 = vmax.f32 %v3988_v33, 0.0  ;;  %v2572_v33 = vld [vmem:[%s5775_s3 + $0xc0] sm:$0xff] }
 0x326   :  { %v3571_v45 = vcombine.high %v2572_v33, %v2572_v33  ;;  %v4285_v58 = vld [vmem:[%s5775_s3 + $0x8] ss:$12 sps:$4 sm:$0xff]  }
 0x327   :  { %v2514_v49 = vmax.f32 %v3989_v1, 0.0  ;;  %v3570_v1 = vcombine.low %v2572_v33, %v2572_v33 }
 0x329   :  { %v2535_v24 = vpack.c.bf16 %v2514_v49, %v2513_v46  ;;  %v4286_v46 = vld [vmem:[%s5775_s3 + $0x20] ss:$12 sps:$4 sm:$0xff]   ;;  %v4287_v49 = vld [vmem:[%s5775_s3 + $0x38] ss:$12 sps:$4 sm:$0xff]  }
 0x32a   :  { %v2458_v40 = vpop.f32.mrb[16].mxu1 }
 0x32b   :  { %v3990_v4 = vadd.f32 %v2458_v40, %v5526_v54  ;;  %v3862_v38 = vpop.f32.mrb[17].mxu1  ;;  %3660 = vmatprep.subr.bf16.mxu0 %v2535_v24  ;;  %v4288_v24 = vld [vmem:[%s5775_s3 + $0x50] ss:$12 sps:$4 sm:$0xff]   ;;  %v4289_v40 = vld [vmem:[%s5775_s3 + $0x68] ss:$12 sps:$4 sm:$0xff]  }
 0x32c   :  { %v2461_v21 = vpop.f32.mrb[18].mxu1  ;;  %3661 = vmatpush3.bf16.msra.mxu0 %v5531_v44  ;;  %v4291_v38 = vld [vmem:[%s5775_s3 + $0x98] ss:$12 sps:$4 sm:$0xff]  }
 0x32d   :  { %v3991_v27 = vadd.f32 %v2461_v21, %v5528_v60  ;;  %v3863_v35 = vpop.f32.mrb[19].mxu1  ;;  %v2515_v55 = vmax.f32 %v3990_v4, 0.0  ;;  %v4290_v4 = vld [vmem:[%s5775_s3 + $0x80] ss:$12 sps:$4 sm:$0xff]   ;;  %v4292_v21 = vld [vmem:[%s5775_s3 + $0xb0] ss:$12 sps:$4 sm:$0xff]  }
 0x32f   :  { %v2516_v11 = vmax.f32 %v3991_v27, 0.0  ;;  %v4293_v27 = vld [vmem:[%s5775_s3 + $0xc8] ss:$0 sps:$4 sm:$0xff]  }
 0x331   :  { %v2536_v37 = vpack.c.bf16 %v2516_v11, %v2515_v55 }
 0x332   :  { %v2466_v18 = vpop.f32.mrb[20].mxu1 }
 0x333   :  { %v3992_v28 = vadd.f32 %v2466_v18, %v5537_v14  ;;  %v3866_v3 = vpop.f32.mrb[21].mxu1  ;;  %3662 = vmatprep.subr.bf16.mxu0 %v2536_v37 }
 0x334   :  { %v2469_v59 = vpop.f32.mrb[22].mxu1  ;;  %3663 = vmatpush3.bf16.msra.mxu0 %v5535_v13 }
 0x335   :  { %v3993_v54 = vadd.f32 %v2469_v59, %v5540_v19  ;;  %v3867_v53 = vpop.f32.mrb[23].mxu1  ;;  %v2517_v0 = vmax.f32 %v3992_v28, 0.0 }
 0x337   :  { %v2518_v31 = vmax.f32 %v3993_v54, 0.0 }
 0x339   :  { %v2537_v44 = vpack.c.bf16 %v2518_v31, %v2517_v0 }
 0x33a   :  { %v2474_v60 = vpop.f32.mrb[24].mxu1 }
 0x33b   :  { %v3994_v15 = vadd.f32 %v2474_v60, %v1489_v6  ;;  %v3870_v30 = vpop.f32.mrb[25].mxu1  ;;  %3664 = vmatprep.subr.bf16.mxu0 %v2537_v44  ;;  %v4296_v44 = vld [vmem:[%s5776_s4 + $0x4] ss:$8 sps:$4 sm:$0xff]  }
 0x33c   :  { %v2477_v7 = vpop.f32.mrb[26].mxu1  ;;  %3665 = vmatpush3.bf16.msra.mxu0 %v5543_v26  ;;  %v4262_v26 = vld [vmem:[%s5775_s3 + $0x1c] ss:$12 sps:$4 sm:$0xff]  }
 0x33d   :  { %v3995_v14 = vadd.f32 %v2477_v7, %v1494_v5  ;;  %v3871_v12 = vpop.f32.mrb[27].mxu1  ;;  %v2519_v16 = vmax.f32 %v3994_v15, 0.0 }
 0x33f   :  { %v2520_v41 = vmax.f32 %v3995_v14, 0.0 }
 0x341   :  { %v2538_v13 = vpack.c.bf16 %v2520_v41, %v2519_v16 }
 0x342   :  { %v2482_v19 = vpop.f32.mrb[28].mxu1 }
 0x343   :  { %v3996_v8 = vadd.f32 %v2482_v19, %v1499_v36  ;;  %v3874_v48 = vpop.f32.mrb[29].mxu1  ;;  %3666 = vmatprep.subr.bf16.mxu0 %v2538_v13 }
 0x344   :  { %v2485_v42 = vpop.f32.mrb[30].mxu1  ;;  %3667 = vmatpush3.bf16.msra.mxu0 %v5548_v61  ;;  %v4265_v61 = vld [vmem:[%s5775_s3 + $0x34] ss:$12 sps:$4 sm:$0xff]  }
 0x345   :  { %v3997_v62 = vadd.f32 %v2485_v42, %v1504_v20  ;;  %v3875_v56 = vpop.f32.mrb[31].mxu1  ;;  %3876 = vmatprep.subr.bf16.mxu0 %v4333_v50  ;;  %v2521_v51 = vmax.f32 %v3996_v8, 0.0 }
 0x347   :  { %v2522_v25 = vmax.f32 %v3997_v62, 0.0  ;;  %2867 = vmatmul.mubr.bf16.vlgmr.msra.gmra.mrb[104].mxu0 %v4259_v9 }
 0x348   :  { %2874 = vmatprep.mubr.bf16.mxu0 %v4262_v26 }
 0x349   :  { %v2539_v57 = vpack.c.bf16 %v2522_v25, %v2521_v51 }
 0x34b   :  { %3877 = vmatpush3.bf16.msra.mxu0 %v2539_v57 }
 0x34c   :  { %3193 = vmatprep.subr.bf16.mxu0 %v4332_v2 }
 0x34f   :  { %2875 = vmatmul.mubr.bf16.gmra.mrb[108].mxu0 %v4264_v47 }
 0x350   :  { %2882 = vmatprep.mubr.bf16.mxu0 %v4265_v61 }
 0x357   :  { %2883 = vmatmul.mubr.bf16.gmra.mrb[112].mxu0 %v4267_v22 }
 0x358   :  { %2890 = vmatprep.mubr.bf16.mxu0 %v4268_v17 }
 0x35f   :  { %2891 = vmatmul.mubr.bf16.gmra.mrb[116].mxu0 %v4270_v29 }
 0x360   :  { %2898 = vmatprep.mubr.bf16.mxu0 %v4271_v23 }
 0x367   :  { %2899 = vmatmul.mubr.bf16.gmra.mrb[120].mxu0 %v4273_v10 }
 0x368   :  { %2906 = vmatprep.mubr.bf16.mxu0 %v4274_v32 }
 0x36f   :  { %2907 = vmatmul.mubr.bf16.gmra.mrb[124].mxu0 %v4276_v34 }
 0x370   :  { %2914 = vmatprep.mubr.bf16.mxu0 %v4277_v39 }
 0x377   :  { %2915 = vmatmul.mubr.bf16.gmra.mrb[128].mxu0 %v4279_v52 }
 0x378   :  { %2922 = vmatprep.mubr.bf16.mxu0 %v4280_v63 }
 0x37f   :  { %2923 = vmatmul.mubr.bf16.gmra.mrb[132].mxu0 %v4282_v43 }
 0x380   :  { %2930 = vmatprep.mubr.bf16.mxu0 %v3571_v45 }
 0x387   :  { %2931 = vmatmul.mubr.bf16.gmra.mrb[136].mxu0 %v3570_v1 }
 0x388   :  { %3878 = vmatprep.mubr.msk.bf16.mxu0 %vm4334_vm1, %v4333_v50 }
 0x38f   :  { %3879 = vmatmul.mubr.msk.bf16.vlgmr.msra.gmra.mrb[140].mxu0 %vm2806_vm2, %v4285_v58  ;;  %v2594_v58 = vpop.permute.xlu0 %2593 }
 0x390   :  { %3882 = vmatprep.mubr.msk.bf16.mxu0 %vm4334_vm1, %v4333_v50 }
 0x397   :  { %3883 = vmatmul.mubr.msk.bf16.gmra.mrb[144].mxu0 %vm2806_vm2, %v4286_v46 }
 0x398   :  { %3886 = vmatprep.mubr.msk.bf16.mxu0 %vm4334_vm1, %v4333_v50 }
 0x39f   :  { %3887 = vmatmul.mubr.msk.bf16.gmra.mrb[148].mxu0 %vm2806_vm2, %v4287_v49  ;;  %v2599_v49 = vpop.permute.xlu1 %2598 }
 0x3a0   :  { %3890 = vmatprep.mubr.msk.bf16.mxu0 %vm4334_vm1, %v4333_v50 }
 0x3a7   :  { %3891 = vmatmul.mubr.msk.bf16.gmra.mrb[152].mxu0 %vm2806_vm2, %v4288_v24 }
 0x3a8   :  { %3894 = vmatprep.mubr.msk.bf16.mxu0 %vm4334_vm1, %v4333_v50 }
 0x3af   :  { %3895 = vmatmul.mubr.msk.bf16.gmra.mrb[156].mxu0 %vm2806_vm2, %v4289_v40 }
 0x3b0   :  { %3898 = vmatprep.mubr.msk.bf16.mxu0 %vm4334_vm1, %v4333_v50 }
 0x3b7   :  { %3899 = vmatmul.mubr.msk.bf16.gmra.mrb[160].mxu0 %vm2806_vm2, %v4290_v4 }
 0x3b8   :  { %3902 = vmatprep.mubr.msk.bf16.mxu0 %vm4334_vm1, %v4333_v50 }
 0x3bf   :  { %3903 = vmatmul.mubr.msk.bf16.gmra.mrb[164].mxu0 %vm2806_vm2, %v4291_v38 }
 0x3c0   :  { %3906 = vmatprep.mubr.msk.bf16.mxu0 %vm4334_vm1, %v4333_v50 }
 0x3c7   :  { %3907 = vmatmul.mubr.msk.bf16.gmra.mrb[168].mxu0 %vm2806_vm2, %v4292_v21 }
 0x3c8   :  { %3910 = vmatprep.mubr.msk.bf16.mxu0 %vm4334_vm1, %v4333_v50 }
 0x3cf   :  { %3911 = vmatmul.mubr.msk.bf16.gmra.mrb[172].mxu0 %vm2806_vm2, %v4293_v27 }
 0x3d0   :  { %3592 = vmatprep.mubr.msk.bf16.mxu0 %vm3173_vm3, %v4296_v44 }
 0x41a   :  { %v3668_v35 = vpop.f32.mrb[104].mxu0 }
 0x41b   :  { %v3669_v55 = vpop.f32.mrb[105].mxu0 }
 0x41c   :  { %v3670_v11 = vadd.f32 %v3669_v55, %v3668_v35  ;;  %v3671_v37 = vpop.f32.mrb[106].mxu0 }
 0x41d   :  { %v3672_v18 = vpop.f32.mrb[107].mxu0 }
 0x41e   :  { %v3673_v28 = vadd.f32 %v3672_v18, %v3671_v37  ;;  %v2869_v46 = vadd.f32 %v3670_v11, %v2594_v58  ;;  %v2604_v18 = vpop.permute.xlu0 %2603 }
 0x420   :  { %v2872_v38 = vadd.f32 %v3673_v28, %v2599_v49 }
 0x422   :  { %v3674_v3 = vpop.f32.mrb[108].mxu0 }
 0x423   :  { %v3675_v59 = vpop.f32.mrb[109].mxu0 }
 0x424   :  { %v3676_v54 = vadd.f32 %v3675_v59, %v3674_v3  ;;  %v3677_v53 = vpop.f32.mrb[110].mxu0 }
 0x425   :  { %v3678_v0 = vpop.f32.mrb[111].mxu0 }
 0x426   :  { %v5676_v31 = vadd.f32 %v3678_v0, %v3677_v53  ;;  %v2877_v59 = vadd.f32 %v3676_v54, %v2604_v18  ;;  %v2609_v53 = vpop.permute.xlu1 %2608 }
 0x428   :  { %v2880_v11 = vadd.f32 %v5676_v31, %v2609_v53 }
 0x42a   :  { %v3680_v50 = vpop.f32.mrb[112].mxu0 }
 0x42b   :  { %v3681_v6 = vpop.f32.mrb[113].mxu0 }
 0x42c   :  { %v5681_v60 = vadd.f32 %v3681_v6, %v3680_v50  ;;  %v3683_v15 = vpop.f32.mrb[114].mxu0 }
 0x42d   :  { %v3684_v30 = vpop.f32.mrb[115].mxu0 }
 0x42e   :  { %v5684_v5 = vadd.f32 %v3684_v30, %v3683_v15 }
 0x432   :  { %v3686_v7 = vpop.f32.mrb[116].mxu0 }
 0x433   :  { %v3687_v14 = vpop.f32.mrb[117].mxu0 }
 0x434   :  { %v5686_v12 = vadd.f32 %v3687_v14, %v3686_v7  ;;  %v3689_v16 = vpop.f32.mrb[118].mxu0  ;;  %v2614_v14 = vpop.permute.xlu0 %2613 }
 0x435   :  { %v3690_v41 = vpop.f32.mrb[119].mxu0 }
 0x436   :  { %v5688_v13 = vadd.f32 %v3690_v41, %v3689_v16  ;;  %v2885_v41 = vadd.f32 %v5681_v60, %v2614_v14 }
 0x43a   :  { %v3692_v36 = vpop.f32.mrb[120].mxu0 }
 0x43b   :  { %v3693_v19 = vpop.f32.mrb[121].mxu0 }
 0x43c   :  { %v5690_v8 = vadd.f32 %v3693_v19, %v3692_v36  ;;  %v3695_v48 = vpop.f32.mrb[122].mxu0  ;;  %v2619_v36 = vpop.permute.xlu1 %2618 }
 0x43d   :  { %v3696_v9 = vpop.f32.mrb[123].mxu0 }
 0x43e   :  { %v5692_v20 = vadd.f32 %v3696_v9, %v3695_v48  ;;  %v2888_v9 = vadd.f32 %v5684_v5, %v2619_v36 }
 0x442   :  { %v3698_v42 = vpop.f32.mrb[124].mxu0 }
 0x443   :  { %v3699_v26 = vpop.f32.mrb[125].mxu0 }
 0x444   :  { %v5694_v62 = vadd.f32 %v3699_v26, %v3698_v42  ;;  %v3701_v56 = vpop.f32.mrb[126].mxu0 }
 0x445   :  { %v3702_v51 = vpop.f32.mrb[127].mxu0 }
 0x446   :  { %v5696_v25 = vadd.f32 %v3702_v51, %v3701_v56 }
 0x44a   :  { %v3704_v57 = vpop.f32.mrb[128].mxu0 }
 0x44b   :  { %v3705_v47 = vpop.f32.mrb[129].mxu0 }
 0x44c   :  { %v5698_v61 = vadd.f32 %v3705_v47, %v3704_v57  ;;  %v3707_v22 = vpop.f32.mrb[130].mxu0  ;;  %v2624_v57 = vpop.permute.xlu0 %2623 }
 0x44d   :  { %v3708_v17 = vpop.f32.mrb[131].mxu0 }
 0x44e   :  { %v5700_v29 = vadd.f32 %v3708_v17, %v3707_v22  ;;  %v2893_v22 = vadd.f32 %v5686_v12, %v2624_v57  ;;  %v2629_v17 = vpop.permute.xlu1 %2628 }
 0x452   :  { %v3710_v23 = vpop.f32.mrb[132].mxu0  ;;  %v2639_v49 = vpop.permute.xlu1 %2638 }
 0x453   :  { %v3711_v10 = vpop.f32.mrb[133].mxu0 }
 0x454   :  { %v5702_v32 = vadd.f32 %v3711_v10, %v3710_v23  ;;  %v3713_v34 = vpop.f32.mrb[134].mxu0 }
 0x455   :  { %v3714_v39 = vpop.f32.mrb[135].mxu0 }
 0x456   :  { %v5704_v52 = vadd.f32 %v3714_v39, %v3713_v34  ;;  %v2896_v34 = vadd.f32 %v5688_v13, %v2629_v17 }
 0x45a   :  { %v3716_v63 = vpop.f32.mrb[136].mxu0 }
 0x45b   :  { %v3717_v33 = vpop.f32.mrb[137].mxu0 }
 0x45c   :  { %v5706_v43 = vadd.f32 %v3717_v33, %v3716_v63  ;;  %v3719_v45 = vpop.f32.mrb[138].mxu0 }
 0x45d   :  { %v3720_v1 = vpop.f32.mrb[139].mxu0 }
 0x45e   :  { %v2634_v1 = vpop.permute.xlu0 %2633 }
 0x462   :  { %v2972_v24 = vpop.f32.mrb[140].mxu0 }
 0x463   :  { %v2973_v40 = vadd.f32 %v2972_v24, %v2869_v46  ;;  %v3880_v4 = vpop.f32.mrb[141].mxu0  ;;  %v2901_v46 = vadd.f32 %v5690_v8, %v2634_v1 }
 0x464   :  { %v2975_v21 = vpop.f32.mrb[142].mxu0  ;;  %v2904_v4 = vadd.f32 %v5692_v20, %v2639_v49  ;;  %v4302_v49 = vld [vmem:[%s5776_s4 + $0x20] ss:$8 sps:$4 sm:$0xff]  }
 0x465   :  { %v2976_v27 = vadd.f32 %v2975_v21, %v2872_v38  ;;  %v3881_v35 = vpop.f32.mrb[143].mxu0  ;;  %v3042_v55 = vmax.f32 %v2973_v40, 0.0 }
 0x467   :  { %v3043_v37 = vmax.f32 %v2976_v27, 0.0 }
 0x469   :  { %v3059_v3 = vpack.c.bf16 %v3043_v37, %v3042_v55  ;;  %v2644_v55 = vpop.permute.xlu0 %2643 }
 0x46a   :  { %v2980_v0 = vpop.f32.mrb[144].mxu0  ;;  %v2909_v18 = vadd.f32 %v5694_v62, %v2644_v55 }
 0x46b   :  { %v2981_v50 = vadd.f32 %v2980_v0, %v2877_v59  ;;  %v3884_v44 = vpop.f32.mrb[145].mxu0  ;;  %3194 = vmatpush1.bf16.msra.mxu0 %v3059_v3  ;;  %v2649_v3 = vpop.permute.xlu1 %2648 }
 0x46c   :  { %v2983_v6 = vpop.f32.mrb[146].mxu0  ;;  %3195 = vmatprep.subr.bf16.mxu0 %v4332_v2  ;;  %v2912_v0 = vadd.f32 %v5696_v25, %v2649_v3 }
 0x46d   :  { %v2984_v15 = vadd.f32 %v2983_v6, %v2880_v11  ;;  %v3885_v28 = vpop.f32.mrb[147].mxu0  ;;  %v3044_v30 = vmax.f32 %v2981_v50, 0.0 }
 0x46f   :  { %v3045_v7 = vmax.f32 %v2984_v15, 0.0  ;;  %v2654_v15 = vpop.permute.xlu0 %2653 }
 0x471   :  { %v3060_v16 = vpack.c.bf16 %v3045_v7, %v3044_v30  ;;  %v2917_v30 = vadd.f32 %v5698_v61, %v2654_v15  ;;  %v2659_v7 = vpop.permute.xlu1 %2658 }
 0x472   :  { %v2988_v54 = vpop.f32.mrb[148].mxu0 }
 0x473   :  { %v2989_v19 = vadd.f32 %v2988_v54, %v2885_v41  ;;  %v3888_v48 = vpop.f32.mrb[149].mxu0  ;;  %3196 = vmatpush1.bf16.msra.mxu0 %v3060_v16  ;;  %v2920_v41 = vadd.f32 %v5700_v29, %v2659_v7 }
 0x474   :  { %v2991_v42 = vpop.f32.mrb[150].mxu0  ;;  %3197 = vmatprep.subr.bf16.mxu0 %v4332_v2 }
 0x475   :  { %v2992_v31 = vadd.f32 %v2991_v42, %v2888_v9  ;;  %v3889_v26 = vpop.f32.mrb[151].mxu0  ;;  %v3046_v56 = vmax.f32 %v2989_v19, 0.0  ;;  %v2664_v9 = vpop.permute.xlu0 %2663 }
 0x476   :  { %v2669_v26 = vpop.permute.xlu1 %2668 }
 0x477   :  { %v3047_v51 = vmax.f32 %v2992_v31, 0.0  ;;  %v2925_v31 = vadd.f32 %v5702_v32, %v2664_v9  ;;  %v2928_v57 = vadd.f32 %v5704_v52, %v2669_v26 }
 0x479   :  { %v3061_v47 = vpack.c.bf16 %v3047_v51, %v3046_v56 }
 0x47a   :  { %v2996_v60 = vpop.f32.mrb[152].mxu0 }
 0x47b   :  { %v2997_v23 = vadd.f32 %v2996_v60, %v2893_v22  ;;  %v3892_v10 = vpop.f32.mrb[153].mxu0  ;;  %3198 = vmatpush1.bf16.msra.mxu0 %v3061_v47 }
 0x47c   :  { %v2999_v39 = vpop.f32.mrb[154].mxu0  ;;  %3199 = vmatprep.subr.bf16.mxu0 %v4332_v2 }
 0x47d   :  { %v3000_v5 = vadd.f32 %v2999_v39, %v2896_v34  ;;  %v3893_v63 = vpop.f32.mrb[155].mxu0  ;;  %v3048_v33 = vmax.f32 %v2997_v23, 0.0  ;;  %v2674_v23 = vpop.permute.xlu0 %2673 }
 0x47e   :  { %v2933_v34 = vadd.f32 %v5706_v43, %v2674_v23  ;;  %v4297_v43 = vld [vmem:[%s5776_s4 + $0x14] ss:$8 sps:$4 sm:$0xff]  }
 0x47f   :  { %v3049_v45 = vmax.f32 %v3000_v5, 0.0 }
 0x481   :  { %v3062_v58 = vpack.c.bf16 %v3049_v45, %v3048_v33 }
 0x482   :  { %v3004_v12 = vpop.f32.mrb[156].mxu0 }
 0x483   :  { %v3005_v24 = vadd.f32 %v3004_v12, %v2901_v46  ;;  %v3896_v40 = vpop.f32.mrb[157].mxu0  ;;  %3200 = vmatpush1.bf16.msra.mxu0 %v3062_v58  ;;  %v4294_v58 = vld [vmem:[%s5776_s4] ss:$8 sps:$4 sm:$0xff]   ;;  %v4300_v46 = vld [vmem:[%s5776_s4 + $0x24] ss:$8 sps:$4 sm:$0xff]  }
 0x484   :  { %v3007_v38 = vpop.f32.mrb[158].mxu0  ;;  %3201 = vmatprep.subr.bf16.mxu0 %v4332_v2  ;;  %v4303_v12 = vld [vmem:[%s5776_s4 + $0x34] ss:$8 sps:$4 sm:$0xff]   ;;  %v4305_v40 = vld [vmem:[%s5776_s4 + $0x30] ss:$8 sps:$4 sm:$0xff]  }
 0x485   :  { %v3008_v13 = vadd.f32 %v3007_v38, %v2904_v4  ;;  %v3897_v21 = vpop.f32.mrb[159].mxu0  ;;  %v3050_v27 = vmax.f32 %v3005_v24, 0.0  ;;  %v3076_v24 = vld [vmem:[%s5776_s4 + $0x40] sm:$0x33] }
 0x486   :  { %v3591_v4 = vcombine.high %v3076_v24, %v3076_v24  ;;  %v3590_v38 = vcombine.low %v3076_v24, %v3076_v24  ;;  %v3094_v21 = vpop.permute.xlu0 %3093 }
 0x487   :  { %v3051_v35 = vmax.f32 %v3008_v13, 0.0  ;;  %v3089_v13 = vpop.permute.xlu1 %3088 }
 0x489   :  { %v3063_v37 = vpack.c.bf16 %v3051_v35, %v3050_v27 }
 0x48a   :  { %v3012_v8 = vpop.f32.mrb[160].mxu0  ;;  %v3104_v35 = vpop.permute.xlu0 %3103 }
 0x48b   :  { %v3013_v59 = vadd.f32 %v3012_v8, %v2909_v18  ;;  %v3900_v53 = vpop.f32.mrb[161].mxu0  ;;  %3202 = vmatpush1.bf16.msra.mxu0 %v3063_v37  ;;  %v3099_v27 = vpop.permute.xlu1 %3098 }
 0x48c   :  { %v3015_v50 = vpop.f32.mrb[162].mxu0  ;;  %3203 = vmatprep.subr.bf16.mxu0 %v4332_v2 }
 0x48d   :  { %v3016_v20 = vadd.f32 %v3015_v50, %v2912_v0  ;;  %v3901_v44 = vpop.f32.mrb[163].mxu0  ;;  %v3052_v11 = vmax.f32 %v3013_v59, 0.0 }
 0x48e   :  { %v3291_v37 = vpop.permute.xlu0 %3290 }
 0x48f   :  { %v3053_v6 = vmax.f32 %v3016_v20, 0.0  ;;  %v3286_v55 = vpop.permute.xlu1 %3285 }
 0x491   :  { %v3064_v28 = vpack.c.bf16 %v3053_v6, %v3052_v11 }
 0x492   :  { %v3020_v62 = vpop.f32.mrb[164].mxu0  ;;  %v3296_v44 = vpop.permute.xlu0 %3295 }
 0x493   :  { %v3021_v14 = vadd.f32 %v3020_v62, %v2917_v30  ;;  %v3904_v16 = vpop.f32.mrb[165].mxu0  ;;  %3204 = vmatpush1.bf16.msra.mxu0 %v3064_v28  ;;  %v3109_v18 = vpop.permute.xlu1 %3108 }
 0x494   :  { %v3023_v36 = vpop.f32.mrb[166].mxu0  ;;  %3205 = vmatprep.subr.bf16.mxu0 %v4332_v2 }
 0x495   :  { %v3024_v25 = vadd.f32 %v3023_v36, %v2920_v41  ;;  %v3905_v54 = vpop.f32.mrb[167].mxu0  ;;  %v3054_v19 = vmax.f32 %v3021_v14, 0.0 }
 0x496   :  { %v3301_v16 = vpop.permute.xlu0 %3300 }
 0x497   :  { %v3055_v48 = vmax.f32 %v3024_v25, 0.0  ;;  %v3114_v6 = vpop.permute.xlu1 %3113 }
 0x499   :  { %v3065_v42 = vpack.c.bf16 %v3055_v48, %v3054_v19 }
 0x49a   :  { %v3028_v61 = vpop.f32.mrb[168].mxu0  ;;  %v3306_v26 = vpop.permute.xlu0 %3305 }
 0x49b   :  { %v3029_v56 = vadd.f32 %v3028_v61, %v2925_v31  ;;  %v3908_v51 = vpop.f32.mrb[169].mxu0  ;;  %3206 = vmatpush1.bf16.msra.mxu0 %v3065_v42  ;;  %v3119_v19 = vpop.permute.xlu1 %3118 }
 0x49c   :  { %v3031_v47 = vpop.f32.mrb[170].mxu0  ;;  %3207 = vmatprep.subr.bf16.mxu0 %v4332_v2 }
 0x49d   :  { %v3032_v29 = vadd.f32 %v3031_v47, %v2928_v57  ;;  %v3909_v22 = vpop.f32.mrb[171].mxu0  ;;  %v3056_v17 = vmax.f32 %v3029_v56, 0.0 }
 0x49f   :  { %v3057_v60 = vmax.f32 %v3032_v29, 0.0  ;;  %v3124_v47 = vpop.permute.xlu1 %3123 }
 0x4a1   :  { %v3066_v10 = vpack.c.bf16 %v3057_v60, %v3056_v17 }
 0x4a2   :  { %v3036_v39 = vpop.f32.mrb[172].mxu0 }
 0x4a3   :  { %v3037_v32 = vadd.f32 %v3036_v39, %v2933_v34  ;;  %3208 = vmatpush1.bf16.msra.mxu0 %v3066_v10  ;;  %v3912_v5 = vpop.f32.mrb[173].mxu0  ;;  %v3311_v34 = vpop.permute.xlu0 %3310 }
 0x4a4   :  { %v3039_v63 = vpop.f32.mrb[174].mxu0  ;;  %3209 = vmatprep.subr.bf16.mxu0 %v4332_v2  ;;  %v4299_v2 = vld [vmem:[%s5776_s4 + $0x10] ss:$8 sps:$4 sm:$0xff]   ;;  %v3129_v5 = vpop.permute.xlu1 %3128  ;;  %s4335_s4 = smov [#allocation2]  }
 0x4a5   :  { %v3058_v33 = vmax.f32 %v3037_v32, 0.0  ;;  %v3913_v52 = vpop.f32.mrb[175].mxu0  ;;  %s3366_s24 = sshll.u32 %s4335_s4, 4  ;;  %s3367_s24 = int_to_ptr.vmem [resolvable:$true] %s3366_s24 }
 0x4a6   :  { %s4308_s25 = scalar_lea.vmem %s3367_s24, 16  ;;  %s4312_s26 = scalar_lea.vmem %s3367_s24, 32 }
 0x4a7   :  { %v3067_v45 = vpack.c.bf16 %v3058_v33, %v3058_v33  ;;  %p4309_p0 = scmp.ne.s32.totalorder %s3367_s24, %s4308_s25  ;;  %p4313_p1 = scmp.lt.s32.totalorder %s3367_s24, %s3367_s24 }
 0x4a8   :  { %v3321_v24 = vpop.permute.xlu1 %3320  ;;  %p4314_p2 = scmp.lt.s32.totalorder %s4312_s26, %s4308_s25 }
 0x4a9   :  { %v3191_v1 = vsel %vm3189_vm4, %v3067_v45, 0 }
 0x4aa   :  { %3210 = vmatpush1.bf16.msra.mxu0 %v3191_v1  ;;  %p4315_p3 = por %p4314_p2, %p4313_p1 }
 0x4ac   :  { %p4316_p4 = pnand %p4315_p3, %p4309_p0 }
 0x4ad   :  { %3226 = vmatmul.mubr.bf16.vlgmr.msra.gmra.mrb[176].mxu0 %v4294_v58 }
 0x4ae   :  { %3593 = vmatprep.mubr.msk.bf16.mxu0 %vm3173_vm3, %v4297_v43 }
 0x4b5   :  { %3234 = vmatmul.mubr.bf16.gmra.mrb[180].mxu0 %v4299_v2 }
 0x4b6   :  { %3594 = vmatprep.mubr.msk.bf16.mxu0 %vm3173_vm3, %v4300_v46  ;;  %v3316_v46 = vpop.permute.xlu0 %3315 }
 0x4bd   :  { %3242 = vmatmul.mubr.bf16.gmra.mrb[184].mxu0 %v4302_v49 }
 0x4be   :  { %3595 = vmatprep.mubr.msk.bf16.mxu0 %vm3173_vm3, %v4303_v12 }
 0x4c5   :  { %3250 = vmatmul.mubr.bf16.gmra.mrb[188].mxu0 %v4305_v40 }
 0x4c6   :  { %3596 = vmatprep.mubr.msk.bf16.mxu0 %vm3173_vm3, %v3591_v4 }
 0x4cd   :  { %3258 = vmatmul.mubr.bf16.gmra.mrb[192].mxu0 %v3590_v38 }
 0x580   :  { %v3227_v3 = vpop.f32.mrb[176].mxu0 }
 0x581   :  { %v3228_v8 = vadd.f32 %v3227_v3, %v3089_v13  ;;  %v3229_v59 = vpop.f32.mrb[177].mxu0 }
 0x582   :  { %v3230_v53 = vpop.f32.mrb[178].mxu0 }
 0x583   :  { %v3265_v0 = vmax.f32 %v3228_v8, 0.0  ;;  %v3231_v50 = vadd.f32 %v3230_v53, %v3094_v21  ;;  %v3232_v20 = vpop.f32.mrb[179].mxu0 }
 0x585   :  { %v3266_v11 = vmax.f32 %v3231_v50, 0.0  ;;  %v3328_v15 = vmul.f32 %v3286_v55, %v3265_v0 }
 0x587   :  { %v3329_v28 = vmul.f32 %v3291_v37, %v3266_v11 }
 0x588   :  { %v3235_v30 = vpop.f32.mrb[180].mxu0 }
 0x589   :  { %v3337_v7 = vadd.f32 %v3329_v28, %v3328_v15  ;;  %v3236_v62 = vadd.f32 %v3235_v30, %v3099_v27  ;;  %v3237_v14 = vpop.f32.mrb[181].mxu0 }
 0x58a   :  { %v3238_v41 = vpop.f32.mrb[182].mxu0 }
 0x58b   :  { %v3267_v36 = vmax.f32 %v3236_v62, 0.0  ;;  %v3239_v25 = vadd.f32 %v3238_v41, %v3104_v35  ;;  %v3240_v54 = vpop.f32.mrb[183].mxu0 }
 0x58d   :  { %v3330_v48 = vmul.f32 %v3296_v44, %v3267_v36  ;;  %v3268_v9 = vmax.f32 %v3239_v25, 0.0 }
 0x58f   :  { %v3338_v42 = vadd.f32 %v3337_v7, %v3330_v48  ;;  %v3331_v31 = vmul.f32 %v3301_v16, %v3268_v9 }
 0x590   :  { %v3243_v61 = vpop.f32.mrb[184].mxu0 }
 0x591   :  { %v3339_v56 = vadd.f32 %v3338_v42, %v3331_v31  ;;  %v3244_v51 = vadd.f32 %v3243_v61, %v3109_v18  ;;  %v3245_v57 = vpop.f32.mrb[185].mxu0  ;;  %v3326_v18 = vpop.permute.xlu0 %3325 }
 0x592   :  { %v3246_v29 = vpop.f32.mrb[186].mxu0 }
 0x593   :  { %v3269_v22 = vmax.f32 %v3244_v51, 0.0  ;;  %v3247_v17 = vadd.f32 %v3246_v29, %v3114_v6  ;;  %v3248_v60 = vpop.f32.mrb[187].mxu0  ;;  %v3356_v6 = vpop.permute.xlu1 %3355 }
 0x595   :  { %v3332_v23 = vmul.f32 %v3306_v26, %v3269_v22  ;;  %v3270_v10 = vmax.f32 %v3247_v17, 0.0 }
 0x597   :  { %v3340_v39 = vadd.f32 %v3339_v56, %v3332_v23  ;;  %v3333_v32 = vmul.f32 %v3311_v34, %v3270_v10 }
 0x598   :  { %v3251_v63 = vpop.f32.mrb[188].mxu0 }
 0x599   :  { %v3341_v33 = vadd.f32 %v3340_v39, %v3333_v32  ;;  %v3252_v52 = vadd.f32 %v3251_v63, %v3119_v19  ;;  %v3253_v45 = vpop.f32.mrb[189].mxu0 }
 0x59a   :  { %v3254_v1 = vpop.f32.mrb[190].mxu0 }
 0x59b   :  { %v3271_v58 = vmax.f32 %v3252_v52, 0.0  ;;  %v3255_v43 = vadd.f32 %v3254_v1, %v3124_v47  ;;  %v3256_v2 = vpop.f32.mrb[191].mxu0 }
 0x59d   :  { %v3334_v49 = vmul.f32 %v3316_v46, %v3271_v58  ;;  %v3272_v12 = vmax.f32 %v3255_v43, 0.0 }
 0x59f   :  { %v3342_v40 = vadd.f32 %v3341_v33, %v3334_v49  ;;  %v3335_v4 = vmul.f32 %v3321_v24, %v3272_v12 }
 0x5a0   :  { %v3259_v38 = vpop.f32.mrb[192].mxu0 }
 0x5a1   :  { %v3343_v13 = vadd.f32 %v3342_v40, %v3335_v4  ;;  %v3260_v21 = vadd.f32 %v3259_v38, %v3129_v5  ;;  %v3261_v27 = vpop.f32.mrb[193].mxu0 }
 0x5a2   :  { %v3262_v35 = vpop.f32.mrb[194].mxu0 }
 0x5a3   :  { %v3273_v55 = vmax.f32 %v3260_v21, 0.0  ;;  %v3263_v37 = vpop.f32.mrb[195].mxu0 }
 0x5a5   :  { %v3336_v3 = vmul.f32 %v3326_v18, %v3273_v55 }
 0x5a7   :  { %v3344_v8 = vsel %vm3189_vm4, %v3336_v3, 0.0 }
 0x5a8   :  { %v3345_v59 = vadd.f32 %v3344_v8, %v3343_v13 }
 0x5aa   :  { %v3346_v53 = vrot.slane %v3345_v59, 4 }
 0x5ac   :  { %v3347_v0 = vadd.f32 %v3346_v53, %v3345_v59 }
 0x5ae   :  { %v3348_v50 = vrot.slane %v3347_v0, 2 }
 0x5b0   :  { %v3349_v20 = vadd.f32 %v3348_v50, %v3347_v0 }
 0x5b2   :  { %v3350_v44 = vrot.slane %v3349_v20, 1 }
 0x5b4   :  { %v3351_v11 = vadd.f32 %v3350_v44, %v3349_v20 }
 0x5b6   :  { %v3358_v15 = vadd.f32 %v3356_v6, %v3351_v11 }
 0x5b8   :  { %3359 = vst [vmem:[#allocation2] sm:$0x1] %v3358_v15 }
 0x5b9   :  { %4319 = shalt.err (!%p4316_p4)
}
 0x5ba   :  { %s4320_s28 = scalar_lea.hbm %s5779_s7, 16 }
 0x5bb   :  { %p4321_p5 = scmp.ne.s32.totalorder %s5779_s7, %s4320_s28  ;;  %p4324_p6 = scmp.lt.u32.totalorder %s4320_s28, %s5779_s7 }
 0x5bd   :  { %p4326_p7 = pnand %p4324_p6, %p4321_p5 }
 0x5bf   :  { %4329 = shalt.err (!%p4326_p7)
}
 0x5c0   :  { %3369 = dma.vmem_to_hbm [thread:$0]  %s3367_s24, 16, %s5779_s7, [#allocation3]  }
 0x5c1   :  { %4330 = dma.done.wait [#allocation3], 16  }
 0x5c2   :  { %4331 = vsyncadd [#allocation3], 4294967280 }
 0x5c3   :  { %3373 = vsyncpa [#allocation3], 1 }

</bundles_post_ra>
